<compile_context>
chip_gen: v7x
topology: tpu7x:2x2x1
jax: 0.10.0
libtpu: 0.0.40
codegen_flags: <defaults>
</compile_context>

<pallas_src>
import functools

import numpy as np

import jax
import jax.numpy as jnp
from jax.experimental import pallas as pl
from jax.experimental.pallas import tpu as pltpu  # noqa: F401  (kept for TPU backend import)

# ---------------- config (small, consistent with the module) ----------------
D_MODEL = 32
N_HEADS = 4          # head_dim = 8
D_FF = 64
N_LAYERS = 2
BN_EPS = 1e-5        # torch BatchNorm1d default
ROPE_THETA = 10000.0  # rotary_embedding_torch default
NEG_BIG = -1e30      # "minus infinity" for masking cross-batch scores


# ---------------- in-kernel math helpers ----------------
def _gelu_tanh(x):
    # tanh-approximate GELU: the transcendental goes to the EUP slot instead of ~10 VALU ops.
    c = 0.7978845608028654  # sqrt(2/pi)
    return 0.5 * x * (1.0 + jnp.tanh(c * (x + 0.044715 * x * x * x)))


def _add_batchnorm_fused(x, y, gamma, beta):
    # residual add + BatchNorm1d(d_model) in training mode (biased variance).
    # mean and mean-of-squares in ONE axis-0 reduction pass (concat along lanes).
    z = x + y
    d = z.shape[1]
    stats = jnp.mean(jnp.concatenate([z, z * z], axis=1), axis=0, keepdims=True)  # [1, 2d]
    mean = stats[:, :d]
    var = stats[:, d:] - mean * mean
    return (z - mean) * jax.lax.rsqrt(var + BN_EPS) * gamma + beta


# ---------------- rotary tables / rotate-half matrix (trace-time constants) ----------------
def rotary_tables(seq_len, head_dim):
    # ABT encoder: sequence = two concatenated halves (inflow|outflow);
    # rotary positions restart at zero for the second half.
    half = seq_len // 2
    inv_freq = 1.0 / (ROPE_THETA ** (jnp.arange(0, head_dim, 2, dtype=jnp.float32) / head_dim))
    t = jnp.arange(half, dtype=jnp.float32)
    freqs = t[:, None] * inv_freq[None, :]           # [half, head_dim/2]
    freqs = jnp.repeat(freqs, 2, axis=-1)            # '... n -> ... (n r)', r=2 (interleaved)
    cos_h, sin_h = jnp.cos(freqs), jnp.sin(freqs)
    return (jnp.concatenate([cos_h, cos_h], axis=0),
            jnp.concatenate([sin_h, sin_h], axis=0))  # each [seq_len, head_dim]


def _rotate_half_matrix_np(d):
    # Interleaved rotate_half as a constant matmul:  rotate_half(x) == x @ R
    #   out[2i]   = -x[2i+1]   ->  R[2i+1, 2i] = -1
    #   out[2i+1] =  x[2i]     ->  R[2i,  2i+1] = +1
    r = np.zeros((d, d), dtype=np.float32)
    r[np.arange(1, d, 2), np.arange(0, d, 2)] = -1.0
    r[np.arange(0, d, 2), np.arange(1, d, 2)] = 1.0
    return r


def _rotate_half_matrix_qkv(d_model):
    # Block-diagonal rotate-half for the fused [., 3*d_model] QKV slab (V block = 0).
    r = _rotate_half_matrix_np(d_model)
    z = np.zeros((d_model, d_model), np.float32)
    r96 = np.block([[r, z, z], [z, r, z], [z, z, z]])
    return jnp.asarray(r96, dtype=jnp.bfloat16)       # entries in {-1, 0, 1}: exact in bf16


def _rope_tables_qkv(bs, seq_len, d_model, n_heads):
    # 96-lane cos/sin tables covering Q|K|V lanes; V lanes: cos=1, sin=0 (identity).
    dk = d_model // n_heads
    cos, sin = rotary_tables(seq_len, dk)             # [seq, dk]
    cos_d = jnp.tile(cos, (bs, n_heads))               # [bs*seq, d_model]
    sin_d = jnp.tile(sin, (bs, n_heads))
    cos96 = jnp.concatenate([cos_d, cos_d, jnp.ones_like(cos_d)], axis=1)
    sin96 = jnp.concatenate([sin_d, sin_d, jnp.zeros_like(sin_d)], axis=1)
    return cos96, sin96                                 # each [bs*seq, 3*d_model]


def _head_lane_mask(bs, seq_len, d_model, n_heads):
    # [n_heads*bs*seq, d_model]: row-group h keeps only lanes of head h.
    rows = bs * seq_len
    dk = d_model // n_heads
    m = np.zeros((n_heads * rows, d_model), np.float32)
    for h in range(n_heads):
        m[h * rows:(h + 1) * rows, h * dk:(h + 1) * dk] = 1.0
    return jnp.asarray(m)


def _batch_bias(bs, seq_len, n_heads):
    # [n_heads*bs*seq, bs*seq]: 0 for same-batch (query,key) pairs, -1e30 for cross-batch.
    rows = bs * seq_len
    bb = np.full((rows, rows), NEG_BIG, np.float32)
    for b in range(bs):
        bb[b * seq_len:(b + 1) * seq_len, b * seq_len:(b + 1) * seq_len] = 0.0
    return jnp.asarray(np.tile(bb, (n_heads, 1)))


# ---------------- the single fused encoder kernel ----------------
def _encoder_kernel(x_ref, r_ref, cos_ref, sin_ref, hm_ref, bb_ref, *refs,
                    n_layers, bs, seq_len, d_model, n_heads):
    rows = bs * seq_len                                  # 16
    layer_refs = refs[:12 * n_layers]
    o_ref = refs[12 * n_layers]

    # layer-invariant loads / constants, hoisted out of the (unrolled) layer loop
    x = x_ref[...]                                       # [rows, d_model] f32 residual stream
    r96 = r_ref[...]                                     # [3d, 3d] bf16 rotate-half (block diag)
    cos96 = cos_ref[...]                                 # [rows, 3d] f32
    sin96 = sin_ref[...]
    hmask = hm_ref[...]                                  # [n_heads*rows, d_model] f32 head lane mask
    bbias = bb_ref[...]                                  # [n_heads*rows, rows] f32 cross-batch -inf
    hm_slices = [hmask[h * rows:(h + 1) * rows, :] for h in range(n_heads)]

    for l in range(n_layers):
        (wqkv, bqkv, wo, bo, g1, be1,
         w1, b1, w2, b2, g2, be2) = layer_refs[12 * l:12 * (l + 1)]

        # fused QKV projection (dk^-0.5 scale already folded into Wq/bq): one bf16 MXU push
        qkv = jnp.dot(x.astype(jnp.bfloat16), wqkv[...],
                      preferred_element_type=jnp.float32) + bqkv[...]     # [rows, 3d]

        # rotary on the whole slab: qkv*cos + rotate_half(qkv)*sin (V lanes are identity)
        qkv = qkv * cos96 + jnp.dot(qkv.astype(jnp.bfloat16), r96,
                                    preferred_element_type=jnp.float32) * sin96

        q = qkv[:, 0:d_model]
        k = qkv[:, d_model:2 * d_model].astype(jnp.bfloat16)
        v = qkv[:, 2 * d_model:3 * d_model].astype(jnp.bfloat16)

        # head-parallel attention: replicate Q along sublanes (one copy per head), mask each
        # row-group to its head's lanes, then one wide QK^T and one wide PV for all heads.
        q_rep = (jnp.concatenate([q] * n_heads, axis=0) * hmask).astype(jnp.bfloat16)
        s = jax.lax.dot_general(q_rep, k, (((1,), (1,)), ((), ())),
                                preferred_element_type=jnp.float32) + bbias   # [nh*rows, rows]

        m = jnp.max(s, axis=-1, keepdims=True)
        e = jnp.exp(s - m)                                        # cross-batch lanes -> exp(-1e30)=0
        inv = pl.reciprocal(jnp.sum(e, axis=-1, keepdims=True), approx=True)  # EUP slot
        w_attn = (e * inv).astype(jnp.bfloat16)

        o_wide = jnp.dot(w_attn, v, preferred_element_type=jnp.float32)        # [nh*rows, d_model]

        # recombine head-major row groups back to [rows, d_model] with constant lane masks
        # (aligned sublane slices; no masked width-8 stores, no scratch).
        attn = hm_slices[0] * o_wide[0:rows, :]
        for h in range(1, n_heads):
            attn = attn + hm_slices[h] * o_wide[h * rows:(h + 1) * rows, :]

        a = jnp.dot(attn.astype(jnp.bfloat16), wo[...],
                    preferred_element_type=jnp.float32) + bo[...]

        # residual + BatchNorm (post-norm)
        x = _add_batchnorm_fused(x, a, g1[...], be1[...])

        # FFN: GELU(x @ W1 + b1) @ W2 + b2, then residual + BatchNorm
        hdn = _gelu_tanh(jnp.dot(x.astype(jnp.bfloat16), w1[...],
                                 preferred_element_type=jnp.float32) + b1[...])
        ff = jnp.dot(hdn.astype(jnp.bfloat16), w2[...],
                     preferred_element_type=jnp.float32) + b2[...]
        x = _add_batchnorm_fused(x, ff, g2[...], be2[...])

    # single HBM write of the final activation slab
    # TODO(synk): if bs*seq ever scales up, present this lane-dense (last dim multiple of 128).
    o_ref[...] = x


def _flatten_layer(p, d_model, n_heads):
    # fuse Q/K/V weights & biases into one [d, 3d] / [1, 3d] operand, fold the dk^-0.5
    # attention scale into Wq/bq (rotary is linear -> commutes), cast weights to bf16
    # (halves HBM DMA); biases / BN params stay f32 rows.
    scale = float(d_model // n_heads) ** -0.5
    wqkv = jnp.concatenate([p["wq"] * scale, p["wk"], p["wv"]], axis=1).astype(jnp.bfloat16)
    bqkv = jnp.concatenate([p["bq"] * scale, p["bk"], p["bv"]], axis=0).reshape(1, 3 * d_model)
    return [
        wqkv, bqkv,
        p["wo"].astype(jnp.bfloat16), p["bo"].reshape(1, -1),
        p["g1"].reshape(1, -1), p["be1"].reshape(1, -1),
        p["w1"].astype(jnp.bfloat16), p["b1"].reshape(1, -1),
        p["w2"].astype(jnp.bfloat16), p["b2"].reshape(1, -1),
        p["g2"].reshape(1, -1), p["be2"].reshape(1, -1),
    ]


@jax.jit
def encoder_forward(src, params):
    # cache=False path: src_kv == src for every layer -> pure self-attention per layer.
    bs, seq_len, d = src.shape
    n_heads = N_HEADS
    n_layers = len(params)

    x2d = src.reshape(bs * seq_len, d)
    cos96, sin96 = _rope_tables_qkv(bs, seq_len, d, n_heads)   # [bs*seq, 3d]
    r96 = _rotate_half_matrix_qkv(d)                           # [3d, 3d] bf16
    hmask = _head_lane_mask(bs, seq_len, d, n_heads)           # [nh*bs*seq, d]
    bbias = _batch_bias(bs, seq_len, n_heads)                  # [nh*bs*seq, bs*seq]

    flat = []
    for p in params:
        flat += _flatten_layer(p, d, n_heads)

    kernel = functools.partial(
        _encoder_kernel, n_layers=n_layers, bs=bs, seq_len=seq_len,
        d_model=d, n_heads=n_heads)

    # Whole-array blocks, no grid: weights (~50 KB bf16) + activations (~25 KB) live in VMEM.
    # Per review: no cross-TensorCore sharding at 16x32 (barrier would cost more than a layer),
    # and no vmem_limit override (true working set ~150-200 KB, far under the default limit).
    out2d = pl.pallas_call(
        kernel,
        out_shape=jax.ShapeDtypeStruct((bs * seq_len, d), jnp.float32),
    )(x2d, r96, cos96, sin96, hmask, bbias, *flat)
    return out2d.reshape(bs, seq_len, d)


# ---------------- plain-JAX reference (mirrors the PyTorch module, f32 "highest") ----------------
def _rotate_half_ref(x):
    xp = x.reshape(x.shape[:-1] + (x.shape[-1] // 2, 2))
    a = xp[..., 0]
    b = xp[..., 1]
    return jnp.stack((-b, a), axis=-1).reshape(x.shape)


def _gelu_ref(x):
    return 0.5 * x * (1.0 + jax.scipy.special.erf(x * 0.7071067811865476))


def _add_batchnorm_ref(x, y, gamma, beta):
    z = x + y
    mean = jnp.mean(z, axis=0, keepdims=True)
    zc = z - mean
    var = jnp.mean(zc * zc, axis=0, keepdims=True)
    return zc * jax.lax.rsqrt(var + BN_EPS) * gamma + beta


def encoder_forward_ref(src, params):
    bs, seq_len, d = src.shape
    h, dk = N_HEADS, d // N_HEADS
    hp = "highest"
    cos, sin = rotary_tables(seq_len, dk)
    x2d = src.reshape(bs * seq_len, d)
    for p in params:
        q = jnp.dot(x2d, p["wq"], precision=hp) + p["bq"]
        k = jnp.dot(x2d, p["wk"], precision=hp) + p["bk"]
        v = jnp.dot(x2d, p["wv"], precision=hp) + p["bv"]

        def to_heads(t):
            return t.reshape(bs, seq_len, h, dk).transpose(0, 2, 1, 3)

        qh, kh, vh = to_heads(q), to_heads(k), to_heads(v)
        qh = qh * cos + _rotate_half_ref(qh) * sin
        kh = kh * cos + _rotate_half_ref(kh) * sin
        s = jnp.einsum("bhqd,bhkd->bhqk", qh, kh, precision=hp) * (float(dk) ** -0.5)
        attn = jax.nn.softmax(s, axis=-1)
        o = jnp.einsum("bhqk,bhkd->bhqd", attn, vh, precision=hp)
        o = o.transpose(0, 2, 1, 3).reshape(bs * seq_len, d)
        o = jnp.dot(o, p["wo"], precision=hp) + p["bo"]
        x2d = _add_batchnorm_ref(x2d, o, p["g1"], p["be1"])
        hid = _gelu_ref(jnp.dot(x2d, p["w1"], precision=hp) + p["b1"])
        ff = jnp.dot(hid, p["w2"], precision=hp) + p["b2"]
        x2d = _add_batchnorm_ref(x2d, ff, p["g2"], p["be2"])
    return x2d.reshape(bs, seq_len, d)


# ---------------- params ----------------
def init_layer_params(key, d_model, d_ff):
    keys = jax.random.split(key, 12)

    def w(k, shape, s=0.08):
        return jax.random.normal(k, shape, jnp.float32) * s

    return dict(
        wq=w(keys[0], (d_model, d_model)), bq=w(keys[1], (d_model,), 0.02),
        wk=w(keys[2], (d_model, d_model)), bk=w(keys[3], (d_model,), 0.02),
        wv=w(keys[4], (d_model, d_model)), bv=w(keys[5], (d_model,), 0.02),
        wo=w(keys[6], (d_model, d_model)), bo=w(keys[7], (d_model,), 0.02),
        g1=jnp.ones((d_model,), jnp.float32), be1=jnp.zeros((d_model,), jnp.float32),
        w1=w(keys[8], (d_model, d_ff)), b1=w(keys[9], (d_ff,), 0.02),
        w2=w(keys[10], (d_ff, d_model)), b2=w(keys[11], (d_model,), 0.02),
        g2=jnp.ones((d_model,), jnp.float32), be2=jnp.zeros((d_model,), jnp.float32),
    )


if __name__ == "__main__":
    key = jax.random.PRNGKey(0)
    kx, kp = jax.random.split(key)
    bs, seq_len = 2, 8                      # seq holds two halves (inflow|outflow) for ABT
    src = jax.random.normal(kx, (bs, seq_len, D_MODEL), dtype=jnp.float32)
    layer_keys = jax.random.split(kp, N_LAYERS)
    params = [init_layer_params(k, D_MODEL, D_FF) for k in layer_keys]

    out = encoder_forward(src, params)
    jax.block_until_ready(out)
    assert out.shape == (bs, seq_len, D_MODEL) and out.dtype == jnp.float32

    ref = encoder_forward_ref(src, params)
    max_err = float(jnp.max(jnp.abs(out - ref)))
    assert max_err < 5e-2, f"mismatch vs JAX reference: max |err| = {max_err}"

    print("KERNEL_OK")
</pallas_src>

<mosaic_0001>
module attributes {stable_mosaic.version = 11 : i64} {
  func.func @_encoder_kernel(%arg0: memref<16x32xf32, #tpu.memory_space<vmem>>, %arg1: memref<96x96xbf16, #tpu.memory_space<vmem>>, %arg2: memref<16x96xf32, #tpu.memory_space<vmem>>, %arg3: memref<16x96xf32, #tpu.memory_space<vmem>>, %arg4: memref<64x32xf32, #tpu.memory_space<vmem>>, %arg5: memref<64x16xf32, #tpu.memory_space<vmem>>, %arg6: memref<32x96xbf16, #tpu.memory_space<vmem>>, %arg7: memref<1x96xf32, #tpu.memory_space<vmem>>, %arg8: memref<32x32xbf16, #tpu.memory_space<vmem>>, %arg9: memref<1x32xf32, #tpu.memory_space<vmem>>, %arg10: memref<1x32xf32, #tpu.memory_space<vmem>>, %arg11: memref<1x32xf32, #tpu.memory_space<vmem>>, %arg12: memref<32x64xbf16, #tpu.memory_space<vmem>>, %arg13: memref<1x64xf32, #tpu.memory_space<vmem>>, %arg14: memref<64x32xbf16, #tpu.memory_space<vmem>>, %arg15: memref<1x32xf32, #tpu.memory_space<vmem>>, %arg16: memref<1x32xf32, #tpu.memory_space<vmem>>, %arg17: memref<1x32xf32, #tpu.memory_space<vmem>>, %arg18: memref<32x96xbf16, #tpu.memory_space<vmem>>, %arg19: memref<1x96xf32, #tpu.memory_space<vmem>>, %arg20: memref<32x32xbf16, #tpu.memory_space<vmem>>, %arg21: memref<1x32xf32, #tpu.memory_space<vmem>>, %arg22: memref<1x32xf32, #tpu.memory_space<vmem>>, %arg23: memref<1x32xf32, #tpu.memory_space<vmem>>, %arg24: memref<32x64xbf16, #tpu.memory_space<vmem>>, %arg25: memref<1x64xf32, #tpu.memory_space<vmem>>, %arg26: memref<64x32xbf16, #tpu.memory_space<vmem>>, %arg27: memref<1x32xf32, #tpu.memory_space<vmem>>, %arg28: memref<1x32xf32, #tpu.memory_space<vmem>>, %arg29: memref<1x32xf32, #tpu.memory_space<vmem>>, %arg30: memref<16x32xf32, #tpu.memory_space<vmem>>) attributes {dimension_semantics = [], scalar_prefetch = 0 : i64, scratch_operands = 0 : i64, tpu.core_type = #tpu.core_type<tc>} {
    %c0 = arith.constant 0 : index
    %c0_0 = arith.constant 0 : index
    %0 = vector.load %arg0[%c0, %c0_0] : memref<16x32xf32, #tpu.memory_space<vmem>>, vector<16x32xf32>
    %c0_1 = arith.constant 0 : index
    %c0_2 = arith.constant 0 : index
    %1 = vector.load %arg1[%c0_1, %c0_2] : memref<96x96xbf16, #tpu.memory_space<vmem>>, vector<96x96xbf16>
    %c0_3 = arith.constant 0 : index
    %c0_4 = arith.constant 0 : index
    %2 = vector.load %arg2[%c0_3, %c0_4] : memref<16x96xf32, #tpu.memory_space<vmem>>, vector<16x96xf32>
    %c0_5 = arith.constant 0 : index
    %c0_6 = arith.constant 0 : index
    %3 = vector.load %arg3[%c0_5, %c0_6] : memref<16x96xf32, #tpu.memory_space<vmem>>, vector<16x96xf32>
    %c0_7 = arith.constant 0 : index
    %c0_8 = arith.constant 0 : index
    %4 = vector.load %arg4[%c0_7, %c0_8] : memref<64x32xf32, #tpu.memory_space<vmem>>, vector<64x32xf32>
    %c0_9 = arith.constant 0 : index
    %c0_10 = arith.constant 0 : index
    %5 = vector.load %arg5[%c0_9, %c0_10] : memref<64x16xf32, #tpu.memory_space<vmem>>, vector<64x16xf32>
    %6 = vector.extract_strided_slice %4 {offsets = [0, 0], sizes = [16, 32], strides = [1, 1]} : vector<64x32xf32> to vector<16x32xf32>
    %7 = vector.extract_strided_slice %4 {offsets = [16, 0], sizes = [16, 32], strides = [1, 1]} : vector<64x32xf32> to vector<16x32xf32>
    %8 = vector.extract_strided_slice %4 {offsets = [32, 0], sizes = [16, 32], strides = [1, 1]} : vector<64x32xf32> to vector<16x32xf32>
    %9 = vector.extract_strided_slice %4 {offsets = [48, 0], sizes = [16, 32], strides = [1, 1]} : vector<64x32xf32> to vector<16x32xf32>
    %10 = arith.truncf %0 : vector<16x32xf32> to vector<16x32xbf16>
    %c0_11 = arith.constant 0 : index
    %c0_12 = arith.constant 0 : index
    %11 = vector.load %arg6[%c0_11, %c0_12] : memref<32x96xbf16, #tpu.memory_space<vmem>>, vector<32x96xbf16>
    %cst = arith.constant dense<0.000000e+00> : vector<16x96xf32>
    %12 = tpu.matmul %10, %11, %cst {dimension_numbers = #tpu.dot_dimension_numbers<[1], [0], [0], [1], [0, 0, 1, 1], [], []>} : vector<16x32xbf16>, vector<32x96xbf16>, vector<16x96xf32> -> vector<16x96xf32>
    %c0_13 = arith.constant 0 : index
    %c0_14 = arith.constant 0 : index
    %13 = vector.load %arg7[%c0_13, %c0_14] : memref<1x96xf32, #tpu.memory_space<vmem>>, vector<1x96xf32>
    %14 = vector.broadcast %13 : vector<1x96xf32> to vector<16x96xf32>
    %15 = arith.addf %12, %14 : vector<16x96xf32>
    %16 = arith.mulf %15, %2 : vector<16x96xf32>
    %17 = arith.truncf %15 : vector<16x96xf32> to vector<16x96xbf16>
    %cst_15 = arith.constant dense<0.000000e+00> : vector<16x96xf32>
    %18 = tpu.matmul %17, %1, %cst_15 {dimension_numbers = #tpu.dot_dimension_numbers<[1], [0], [0], [1], [0, 0, 1, 1], [], []>} : vector<16x96xbf16>, vector<96x96xbf16>, vector<16x96xf32> -> vector<16x96xf32>
    %19 = arith.mulf %18, %3 : vector<16x96xf32>
    %20 = arith.addf %16, %19 : vector<16x96xf32>
    %21 = vector.extract_strided_slice %20 {offsets = [0, 0], sizes = [16, 32], strides = [1, 1]} : vector<16x96xf32> to vector<16x32xf32>
    %22 = vector.extract_strided_slice %20 {offsets = [0, 32], sizes = [16, 32], strides = [1, 1]} : vector<16x96xf32> to vector<16x32xf32>
    %23 = arith.truncf %22 : vector<16x32xf32> to vector<16x32xbf16>
    %24 = vector.extract_strided_slice %20 {offsets = [0, 64], sizes = [16, 32], strides = [1, 1]} : vector<16x96xf32> to vector<16x32xf32>
    %25 = arith.truncf %24 : vector<16x32xf32> to vector<16x32xbf16>
    %26 = tpu.concatenate %21, %21, %21, %21 in 0 : vector<16x32xf32>, vector<16x32xf32>, vector<16x32xf32>, vector<16x32xf32> -> vector<64x32xf32>
    %27 = arith.mulf %26, %4 : vector<64x32xf32>
    %28 = arith.truncf %27 : vector<64x32xf32> to vector<64x32xbf16>
    %cst_16 = arith.constant dense<0.000000e+00> : vector<64x16xf32>
    %29 = tpu.matmul %28, %23, %cst_16 {dimension_numbers = #tpu.dot_dimension_numbers<[1], [1], [0], [0], [0, 0, 1, 0], [], []>} : vector<64x32xbf16>, vector<16x32xbf16>, vector<64x16xf32> -> vector<64x16xf32>
    %30 = arith.addf %29, %5 : vector<64x16xf32>
    %cst_17 = arith.constant dense<0xFF800000> : vector<64xf32>
    %31 = vector.multi_reduction <maximumf>, %30, %cst_17 [1] : vector<64x16xf32> to vector<64xf32>
    %32 = vector.shape_cast %31 : vector<64xf32> to vector<64x1xf32>
    %33 = vector.broadcast %32 : vector<64x1xf32> to vector<64x16xf32>
    %34 = arith.subf %30, %33 : vector<64x16xf32>
    %35 = math.exp %34 : vector<64x16xf32>
    %cst_18 = arith.constant dense<0.000000e+00> : vector<64xf32>
    %36 = vector.multi_reduction <add>, %35, %cst_18 [1] : vector<64x16xf32> to vector<64xf32>
    %37 = vector.shape_cast %36 : vector<64xf32> to vector<64x1xf32>
    %38 = tpu.reciprocal %37 {approx = true} : vector<64x1xf32> -> vector<64x1xf32>
    %39 = vector.broadcast %38 : vector<64x1xf32> to vector<64x16xf32>
    %40 = arith.mulf %35, %39 : vector<64x16xf32>
    %41 = arith.truncf %40 : vector<64x16xf32> to vector<64x16xbf16>
    %cst_19 = arith.constant dense<0.000000e+00> : vector<64x32xf32>
    %42 = tpu.matmul %41, %25, %cst_19 {dimension_numbers = #tpu.dot_dimension_numbers<[1], [0], [0], [1], [0, 0, 1, 1], [], []>} : vector<64x16xbf16>, vector<16x32xbf16>, vector<64x32xf32> -> vector<64x32xf32>
    %43 = vector.extract_strided_slice %42 {offsets = [0, 0], sizes = [16, 32], strides = [1, 1]} : vector<64x32xf32> to vector<16x32xf32>
    %44 = arith.mulf %6, %43 : vector<16x32xf32>
    %45 = vector.extract_strided_slice %42 {offsets = [16, 0], sizes = [16, 32], strides = [1, 1]} : vector<64x32xf32> to vector<16x32xf32>
    %46 = arith.mulf %7, %45 : vector<16x32xf32>
    %47 = arith.addf %44, %46 : vector<16x32xf32>
    %48 = vector.extract_strided_slice %42 {offsets = [32, 0], sizes = [16, 32], strides = [1, 1]} : vector<64x32xf32> to vector<16x32xf32>
    %49 = arith.mulf %8, %48 : vector<16x32xf32>
    %50 = arith.addf %47, %49 : vector<16x32xf32>
    %51 = vector.extract_strided_slice %42 {offsets = [48, 0], sizes = [16, 32], strides = [1, 1]} : vector<64x32xf32> to vector<16x32xf32>
    %52 = arith.mulf %9, %51 : vector<16x32xf32>
    %53 = arith.addf %50, %52 : vector<16x32xf32>
    %54 = arith.truncf %53 : vector<16x32xf32> to vector<16x32xbf16>
    %c0_20 = arith.constant 0 : index
    %c0_21 = arith.constant 0 : index
    %55 = vector.load %arg8[%c0_20, %c0_21] : memref<32x32xbf16, #tpu.memory_space<vmem>>, vector<32x32xbf16>
    %cst_22 = arith.constant dense<0.000000e+00> : vector<16x32xf32>
    %56 = tpu.matmul %54, %55, %cst_22 {dimension_numbers = #tpu.dot_dimension_numbers<[1], [0], [0], [1], [0, 0, 1, 1], [], []>} : vector<16x32xbf16>, vector<32x32xbf16>, vector<16x32xf32> -> vector<16x32xf32>
    %c0_23 = arith.constant 0 : index
    %c0_24 = arith.constant 0 : index
    %57 = vector.load %arg9[%c0_23, %c0_24] : memref<1x32xf32, #tpu.memory_space<vmem>>, vector<1x32xf32>
    %58 = vector.broadcast %57 : vector<1x32xf32> to vector<16x32xf32>
    %59 = arith.addf %56, %58 : vector<16x32xf32>
    %c0_25 = arith.constant 0 : index
    %c0_26 = arith.constant 0 : index
    %60 = vector.load %arg10[%c0_25, %c0_26] : memref<1x32xf32, #tpu.memory_space<vmem>>, vector<1x32xf32>
    %c0_27 = arith.constant 0 : index
    %c0_28 = arith.constant 0 : index
    %61 = vector.load %arg11[%c0_27, %c0_28] : memref<1x32xf32, #tpu.memory_space<vmem>>, vector<1x32xf32>
    %62 = arith.addf %0, %59 : vector<16x32xf32>
    %63 = arith.mulf %62, %62 : vector<16x32xf32>
    %64 = tpu.concatenate %62, %63 in 1 : vector<16x32xf32>, vector<16x32xf32> -> vector<16x64xf32>
    %cst_29 = arith.constant dense<0.000000e+00> : vector<64xf32>
    %65 = vector.multi_reduction <add>, %64, %cst_29 [0] : vector<16x64xf32> to vector<64xf32>
    %66 = vector.shape_cast %65 : vector<64xf32> to vector<1x64xf32>
    %cst_30 = arith.constant 1.600000e+01 : f32
    %67 = vector.broadcast %cst_30 : f32 to vector<1x64xf32>
    %68 = arith.divf %66, %67 : vector<1x64xf32>
    %69 = vector.extract_strided_slice %68 {offsets = [0, 0], sizes = [1, 32], strides = [1, 1]} : vector<1x64xf32> to vector<1x32xf32>
    %70 = vector.extract_strided_slice %68 {offsets = [0, 32], sizes = [1, 32], strides = [1, 1]} : vector<1x64xf32> to vector<1x32xf32>
    %71 = arith.mulf %69, %69 : vector<1x32xf32>
    %72 = arith.subf %70, %71 : vector<1x32xf32>
    %73 = vector.broadcast %69 : vector<1x32xf32> to vector<16x32xf32>
    %74 = arith.subf %62, %73 : vector<16x32xf32>
    %cst_31 = arith.constant 9.99999974E-6 : f32
    %75 = vector.broadcast %cst_31 : f32 to vector<1x32xf32>
    %76 = arith.addf %72, %75 : vector<1x32xf32>
    %77 = math.rsqrt %76 : vector<1x32xf32>
    %78 = vector.broadcast %77 : vector<1x32xf32> to vector<16x32xf32>
    %79 = arith.mulf %74, %78 : vector<16x32xf32>
    %80 = vector.broadcast %60 : vector<1x32xf32> to vector<16x32xf32>
    %81 = arith.mulf %79, %80 : vector<16x32xf32>
    %82 = vector.broadcast %61 : vector<1x32xf32> to vector<16x32xf32>
    %83 = arith.addf %81, %82 : vector<16x32xf32>
    %84 = arith.truncf %83 : vector<16x32xf32> to vector<16x32xbf16>
    %c0_32 = arith.constant 0 : index
    %c0_33 = arith.constant 0 : index
    %85 = vector.load %arg12[%c0_32, %c0_33] : memref<32x64xbf16, #tpu.memory_space<vmem>>, vector<32x64xbf16>
    %cst_34 = arith.constant dense<0.000000e+00> : vector<16x64xf32>
    %86 = tpu.matmul %84, %85, %cst_34 {dimension_numbers = #tpu.dot_dimension_numbers<[1], [0], [0], [1], [0, 0, 1, 1], [], []>} : vector<16x32xbf16>, vector<32x64xbf16>, vector<16x64xf32> -> vector<16x64xf32>
    %c0_35 = arith.constant 0 : index
    %c0_36 = arith.constant 0 : index
    %87 = vector.load %arg13[%c0_35, %c0_36] : memref<1x64xf32, #tpu.memory_space<vmem>>, vector<1x64xf32>
    %88 = vector.broadcast %87 : vector<1x64xf32> to vector<16x64xf32>
    %89 = arith.addf %86, %88 : vector<16x64xf32>
    %cst_37 = arith.constant 5.000000e-01 : f32
    %90 = vector.broadcast %cst_37 : f32 to vector<16x64xf32>
    %91 = arith.mulf %90, %89 : vector<16x64xf32>
    %cst_38 = arith.constant 4.471500e-02 : f32
    %92 = vector.broadcast %cst_38 : f32 to vector<16x64xf32>
    %93 = arith.mulf %92, %89 : vector<16x64xf32>
    %94 = arith.mulf %93, %89 : vector<16x64xf32>
    %95 = arith.mulf %94, %89 : vector<16x64xf32>
    %96 = arith.addf %89, %95 : vector<16x64xf32>
    %cst_39 = arith.constant 0.797884583 : f32
    %97 = vector.broadcast %cst_39 : f32 to vector<16x64xf32>
    %98 = arith.mulf %97, %96 : vector<16x64xf32>
    %99 = math.tanh %98 : vector<16x64xf32>
    %cst_40 = arith.constant 1.000000e+00 : f32
    %100 = vector.broadcast %cst_40 : f32 to vector<16x64xf32>
    %101 = arith.addf %100, %99 : vector<16x64xf32>
    %102 = arith.mulf %91, %101 : vector<16x64xf32>
    %103 = arith.truncf %102 : vector<16x64xf32> to vector<16x64xbf16>
    %c0_41 = arith.constant 0 : index
    %c0_42 = arith.constant 0 : index
    %104 = vector.load %arg14[%c0_41, %c0_42] : memref<64x32xbf16, #tpu.memory_space<vmem>>, vector<64x32xbf16>
    %cst_43 = arith.constant dense<0.000000e+00> : vector<16x32xf32>
    %105 = tpu.matmul %103, %104, %cst_43 {dimension_numbers = #tpu.dot_dimension_numbers<[1], [0], [0], [1], [0, 0, 1, 1], [], []>} : vector<16x64xbf16>, vector<64x32xbf16>, vector<16x32xf32> -> vector<16x32xf32>
    %c0_44 = arith.constant 0 : index
    %c0_45 = arith.constant 0 : index
    %106 = vector.load %arg15[%c0_44, %c0_45] : memref<1x32xf32, #tpu.memory_space<vmem>>, vector<1x32xf32>
    %107 = vector.broadcast %106 : vector<1x32xf32> to vector<16x32xf32>
    %108 = arith.addf %105, %107 : vector<16x32xf32>
    %c0_46 = arith.constant 0 : index
    %c0_47 = arith.constant 0 : index
    %109 = vector.load %arg16[%c0_46, %c0_47] : memref<1x32xf32, #tpu.memory_space<vmem>>, vector<1x32xf32>
    %c0_48 = arith.constant 0 : index
    %c0_49 = arith.constant 0 : index
    %110 = vector.load %arg17[%c0_48, %c0_49] : memref<1x32xf32, #tpu.memory_space<vmem>>, vector<1x32xf32>
    %111 = arith.addf %83, %108 : vector<16x32xf32>
    %112 = arith.mulf %111, %111 : vector<16x32xf32>
    %113 = tpu.concatenate %111, %112 in 1 : vector<16x32xf32>, vector<16x32xf32> -> vector<16x64xf32>
    %cst_50 = arith.constant dense<0.000000e+00> : vector<64xf32>
    %114 = vector.multi_reduction <add>, %113, %cst_50 [0] : vector<16x64xf32> to vector<64xf32>
    %115 = vector.shape_cast %114 : vector<64xf32> to vector<1x64xf32>
    %cst_51 = arith.constant 1.600000e+01 : f32
    %116 = vector.broadcast %cst_51 : f32 to vector<1x64xf32>
    %117 = arith.divf %115, %116 : vector<1x64xf32>
    %118 = vector.extract_strided_slice %117 {offsets = [0, 0], sizes = [1, 32], strides = [1, 1]} : vector<1x64xf32> to vector<1x32xf32>
    %119 = vector.extract_strided_slice %117 {offsets = [0, 32], sizes = [1, 32], strides = [1, 1]} : vector<1x64xf32> to vector<1x32xf32>
    %120 = arith.mulf %118, %118 : vector<1x32xf32>
    %121 = arith.subf %119, %120 : vector<1x32xf32>
    %122 = vector.broadcast %118 : vector<1x32xf32> to vector<16x32xf32>
    %123 = arith.subf %111, %122 : vector<16x32xf32>
    %cst_52 = arith.constant 9.99999974E-6 : f32
    %124 = vector.broadcast %cst_52 : f32 to vector<1x32xf32>
    %125 = arith.addf %121, %124 : vector<1x32xf32>
    %126 = math.rsqrt %125 : vector<1x32xf32>
    %127 = vector.broadcast %126 : vector<1x32xf32> to vector<16x32xf32>
    %128 = arith.mulf %123, %127 : vector<16x32xf32>
    %129 = vector.broadcast %109 : vector<1x32xf32> to vector<16x32xf32>
    %130 = arith.mulf %128, %129 : vector<16x32xf32>
    %131 = vector.broadcast %110 : vector<1x32xf32> to vector<16x32xf32>
    %132 = arith.addf %130, %131 : vector<16x32xf32>
    %133 = arith.truncf %132 : vector<16x32xf32> to vector<16x32xbf16>
    %c0_53 = arith.constant 0 : index
    %c0_54 = arith.constant 0 : index
    %134 = vector.load %arg18[%c0_53, %c0_54] : memref<32x96xbf16, #tpu.memory_space<vmem>>, vector<32x96xbf16>
    %cst_55 = arith.constant dense<0.000000e+00> : vector<16x96xf32>
    %135 = tpu.matmul %133, %134, %cst_55 {dimension_numbers = #tpu.dot_dimension_numbers<[1], [0], [0], [1], [0, 0, 1, 1], [], []>} : vector<16x32xbf16>, vector<32x96xbf16>, vector<16x96xf32> -> vector<16x96xf32>
    %c0_56 = arith.constant 0 : index
    %c0_57 = arith.constant 0 : index
    %136 = vector.load %arg19[%c0_56, %c0_57] : memref<1x96xf32, #tpu.memory_space<vmem>>, vector<1x96xf32>
    %137 = vector.broadcast %136 : vector<1x96xf32> to vector<16x96xf32>
    %138 = arith.addf %135, %137 : vector<16x96xf32>
    %139 = arith.mulf %138, %2 : vector<16x96xf32>
    %140 = arith.truncf %138 : vector<16x96xf32> to vector<16x96xbf16>
    %cst_58 = arith.constant dense<0.000000e+00> : vector<16x96xf32>
    %141 = tpu.matmul %140, %1, %cst_58 {dimension_numbers = #tpu.dot_dimension_numbers<[1], [0], [0], [1], [0, 0, 1, 1], [], []>} : vector<16x96xbf16>, vector<96x96xbf16>, vector<16x96xf32> -> vector<16x96xf32>
    %142 = arith.mulf %141, %3 : vector<16x96xf32>
    %143 = arith.addf %139, %142 : vector<16x96xf32>
    %144 = vector.extract_strided_slice %143 {offsets = [0, 0], sizes = [16, 32], strides = [1, 1]} : vector<16x96xf32> to vector<16x32xf32>
    %145 = vector.extract_strided_slice %143 {offsets = [0, 32], sizes = [16, 32], strides = [1, 1]} : vector<16x96xf32> to vector<16x32xf32>
    %146 = arith.truncf %145 : vector<16x32xf32> to vector<16x32xbf16>
    %147 = vector.extract_strided_slice %143 {offsets = [0, 64], sizes = [16, 32], strides = [1, 1]} : vector<16x96xf32> to vector<16x32xf32>
    %148 = arith.truncf %147 : vector<16x32xf32> to vector<16x32xbf16>
    %149 = tpu.concatenate %144, %144, %144, %144 in 0 : vector<16x32xf32>, vector<16x32xf32>, vector<16x32xf32>, vector<16x32xf32> -> vector<64x32xf32>
    %150 = arith.mulf %149, %4 : vector<64x32xf32>
    %151 = arith.truncf %150 : vector<64x32xf32> to vector<64x32xbf16>
    %cst_59 = arith.constant dense<0.000000e+00> : vector<64x16xf32>
    %152 = tpu.matmul %151, %146, %cst_59 {dimension_numbers = #tpu.dot_dimension_numbers<[1], [1], [0], [0], [0, 0, 1, 0], [], []>} : vector<64x32xbf16>, vector<16x32xbf16>, vector<64x16xf32> -> vector<64x16xf32>
    %153 = arith.addf %152, %5 : vector<64x16xf32>
    %cst_60 = arith.constant dense<0xFF800000> : vector<64xf32>
    %154 = vector.multi_reduction <maximumf>, %153, %cst_60 [1] : vector<64x16xf32> to vector<64xf32>
    %155 = vector.shape_cast %154 : vector<64xf32> to vector<64x1xf32>
    %156 = vector.broadcast %155 : vector<64x1xf32> to vector<64x16xf32>
    %157 = arith.subf %153, %156 : vector<64x16xf32>
    %158 = math.exp %157 : vector<64x16xf32>
    %cst_61 = arith.constant dense<0.000000e+00> : vector<64xf32>
    %159 = vector.multi_reduction <add>, %158, %cst_61 [1] : vector<64x16xf32> to vector<64xf32>
    %160 = vector.shape_cast %159 : vector<64xf32> to vector<64x1xf32>
    %161 = tpu.reciprocal %160 {approx = true} : vector<64x1xf32> -> vector<64x1xf32>
    %162 = vector.broadcast %161 : vector<64x1xf32> to vector<64x16xf32>
    %163 = arith.mulf %158, %162 : vector<64x16xf32>
    %164 = arith.truncf %163 : vector<64x16xf32> to vector<64x16xbf16>
    %cst_62 = arith.constant dense<0.000000e+00> : vector<64x32xf32>
    %165 = tpu.matmul %164, %148, %cst_62 {dimension_numbers = #tpu.dot_dimension_numbers<[1], [0], [0], [1], [0, 0, 1, 1], [], []>} : vector<64x16xbf16>, vector<16x32xbf16>, vector<64x32xf32> -> vector<64x32xf32>
    %166 = vector.extract_strided_slice %165 {offsets = [0, 0], sizes = [16, 32], strides = [1, 1]} : vector<64x32xf32> to vector<16x32xf32>
    %167 = arith.mulf %6, %166 : vector<16x32xf32>
    %168 = vector.extract_strided_slice %165 {offsets = [16, 0], sizes = [16, 32], strides = [1, 1]} : vector<64x32xf32> to vector<16x32xf32>
    %169 = arith.mulf %7, %168 : vector<16x32xf32>
    %170 = arith.addf %167, %169 : vector<16x32xf32>
    %171 = vector.extract_strided_slice %165 {offsets = [32, 0], sizes = [16, 32], strides = [1, 1]} : vector<64x32xf32> to vector<16x32xf32>
    %172 = arith.mulf %8, %171 : vector<16x32xf32>
    %173 = arith.addf %170, %172 : vector<16x32xf32>
    %174 = vector.extract_strided_slice %165 {offsets = [48, 0], sizes = [16, 32], strides = [1, 1]} : vector<64x32xf32> to vector<16x32xf32>
    %175 = arith.mulf %9, %174 : vector<16x32xf32>
    %176 = arith.addf %173, %175 : vector<16x32xf32>
    %177 = arith.truncf %176 : vector<16x32xf32> to vector<16x32xbf16>
    %c0_63 = arith.constant 0 : index
    %c0_64 = arith.constant 0 : index
    %178 = vector.load %arg20[%c0_63, %c0_64] : memref<32x32xbf16, #tpu.memory_space<vmem>>, vector<32x32xbf16>
    %cst_65 = arith.constant dense<0.000000e+00> : vector<16x32xf32>
    %179 = tpu.matmul %177, %178, %cst_65 {dimension_numbers = #tpu.dot_dimension_numbers<[1], [0], [0], [1], [0, 0, 1, 1], [], []>} : vector<16x32xbf16>, vector<32x32xbf16>, vector<16x32xf32> -> vector<16x32xf32>
    %c0_66 = arith.constant 0 : index
    %c0_67 = arith.constant 0 : index
    %180 = vector.load %arg21[%c0_66, %c0_67] : memref<1x32xf32, #tpu.memory_space<vmem>>, vector<1x32xf32>
    %181 = vector.broadcast %180 : vector<1x32xf32> to vector<16x32xf32>
    %182 = arith.addf %179, %181 : vector<16x32xf32>
    %c0_68 = arith.constant 0 : index
    %c0_69 = arith.constant 0 : index
    %183 = vector.load %arg22[%c0_68, %c0_69] : memref<1x32xf32, #tpu.memory_space<vmem>>, vector<1x32xf32>
    %c0_70 = arith.constant 0 : index
    %c0_71 = arith.constant 0 : index
    %184 = vector.load %arg23[%c0_70, %c0_71] : memref<1x32xf32, #tpu.memory_space<vmem>>, vector<1x32xf32>
    %185 = arith.addf %132, %182 : vector<16x32xf32>
    %186 = arith.mulf %185, %185 : vector<16x32xf32>
    %187 = tpu.concatenate %185, %186 in 1 : vector<16x32xf32>, vector<16x32xf32> -> vector<16x64xf32>
    %cst_72 = arith.constant dense<0.000000e+00> : vector<64xf32>
    %188 = vector.multi_reduction <add>, %187, %cst_72 [0] : vector<16x64xf32> to vector<64xf32>
    %189 = vector.shape_cast %188 : vector<64xf32> to vector<1x64xf32>
    %cst_73 = arith.constant 1.600000e+01 : f32
    %190 = vector.broadcast %cst_73 : f32 to vector<1x64xf32>
    %191 = arith.divf %189, %190 : vector<1x64xf32>
    %192 = vector.extract_strided_slice %191 {offsets = [0, 0], sizes = [1, 32], strides = [1, 1]} : vector<1x64xf32> to vector<1x32xf32>
    %193 = vector.extract_strided_slice %191 {offsets = [0, 32], sizes = [1, 32], strides = [1, 1]} : vector<1x64xf32> to vector<1x32xf32>
    %194 = arith.mulf %192, %192 : vector<1x32xf32>
    %195 = arith.subf %193, %194 : vector<1x32xf32>
    %196 = vector.broadcast %192 : vector<1x32xf32> to vector<16x32xf32>
    %197 = arith.subf %185, %196 : vector<16x32xf32>
    %cst_74 = arith.constant 9.99999974E-6 : f32
    %198 = vector.broadcast %cst_74 : f32 to vector<1x32xf32>
    %199 = arith.addf %195, %198 : vector<1x32xf32>
    %200 = math.rsqrt %199 : vector<1x32xf32>
    %201 = vector.broadcast %200 : vector<1x32xf32> to vector<16x32xf32>
    %202 = arith.mulf %197, %201 : vector<16x32xf32>
    %203 = vector.broadcast %183 : vector<1x32xf32> to vector<16x32xf32>
    %204 = arith.mulf %202, %203 : vector<16x32xf32>
    %205 = vector.broadcast %184 : vector<1x32xf32> to vector<16x32xf32>
    %206 = arith.addf %204, %205 : vector<16x32xf32>
    %207 = arith.truncf %206 : vector<16x32xf32> to vector<16x32xbf16>
    %c0_75 = arith.constant 0 : index
    %c0_76 = arith.constant 0 : index
    %208 = vector.load %arg24[%c0_75, %c0_76] : memref<32x64xbf16, #tpu.memory_space<vmem>>, vector<32x64xbf16>
    %cst_77 = arith.constant dense<0.000000e+00> : vector<16x64xf32>
    %209 = tpu.matmul %207, %208, %cst_77 {dimension_numbers = #tpu.dot_dimension_numbers<[1], [0], [0], [1], [0, 0, 1, 1], [], []>} : vector<16x32xbf16>, vector<32x64xbf16>, vector<16x64xf32> -> vector<16x64xf32>
    %c0_78 = arith.constant 0 : index
    %c0_79 = arith.constant 0 : index
    %210 = vector.load %arg25[%c0_78, %c0_79] : memref<1x64xf32, #tpu.memory_space<vmem>>, vector<1x64xf32>
    %211 = vector.broadcast %210 : vector<1x64xf32> to vector<16x64xf32>
    %212 = arith.addf %209, %211 : vector<16x64xf32>
    %cst_80 = arith.constant 5.000000e-01 : f32
    %213 = vector.broadcast %cst_80 : f32 to vector<16x64xf32>
    %214 = arith.mulf %213, %212 : vector<16x64xf32>
    %cst_81 = arith.constant 4.471500e-02 : f32
    %215 = vector.broadcast %cst_81 : f32 to vector<16x64xf32>
    %216 = arith.mulf %215, %212 : vector<16x64xf32>
    %217 = arith.mulf %216, %212 : vector<16x64xf32>
    %218 = arith.mulf %217, %212 : vector<16x64xf32>
    %219 = arith.addf %212, %218 : vector<16x64xf32>
    %cst_82 = arith.constant 0.797884583 : f32
    %220 = vector.broadcast %cst_82 : f32 to vector<16x64xf32>
    %221 = arith.mulf %220, %219 : vector<16x64xf32>
    %222 = math.tanh %221 : vector<16x64xf32>
    %cst_83 = arith.constant 1.000000e+00 : f32
    %223 = vector.broadcast %cst_83 : f32 to vector<16x64xf32>
    %224 = arith.addf %223, %222 : vector<16x64xf32>
    %225 = arith.mulf %214, %224 : vector<16x64xf32>
    %226 = arith.truncf %225 : vector<16x64xf32> to vector<16x64xbf16>
    %c0_84 = arith.constant 0 : index
    %c0_85 = arith.constant 0 : index
    %227 = vector.load %arg26[%c0_84, %c0_85] : memref<64x32xbf16, #tpu.memory_space<vmem>>, vector<64x32xbf16>
    %cst_86 = arith.constant dense<0.000000e+00> : vector<16x32xf32>
    %228 = tpu.matmul %226, %227, %cst_86 {dimension_numbers = #tpu.dot_dimension_numbers<[1], [0], [0], [1], [0, 0, 1, 1], [], []>} : vector<16x64xbf16>, vector<64x32xbf16>, vector<16x32xf32> -> vector<16x32xf32>
    %c0_87 = arith.constant 0 : index
    %c0_88 = arith.constant 0 : index
    %229 = vector.load %arg27[%c0_87, %c0_88] : memref<1x32xf32, #tpu.memory_space<vmem>>, vector<1x32xf32>
    %230 = vector.broadcast %229 : vector<1x32xf32> to vector<16x32xf32>
    %231 = arith.addf %228, %230 : vector<16x32xf32>
    %c0_89 = arith.constant 0 : index
    %c0_90 = arith.constant 0 : index
    %232 = vector.load %arg28[%c0_89, %c0_90] : memref<1x32xf32, #tpu.memory_space<vmem>>, vector<1x32xf32>
    %c0_91 = arith.constant 0 : index
    %c0_92 = arith.constant 0 : index
    %233 = vector.load %arg29[%c0_91, %c0_92] : memref<1x32xf32, #tpu.memory_space<vmem>>, vector<1x32xf32>
    %234 = arith.addf %206, %231 : vector<16x32xf32>
    %235 = arith.mulf %234, %234 : vector<16x32xf32>
    %236 = tpu.concatenate %234, %235 in 1 : vector<16x32xf32>, vector<16x32xf32> -> vector<16x64xf32>
    %cst_93 = arith.constant dense<0.000000e+00> : vector<64xf32>
    %237 = vector.multi_reduction <add>, %236, %cst_93 [0] : vector<16x64xf32> to vector<64xf32>
    %238 = vector.shape_cast %237 : vector<64xf32> to vector<1x64xf32>
    %cst_94 = arith.constant 1.600000e+01 : f32
    %239 = vector.broadcast %cst_94 : f32 to vector<1x64xf32>
    %240 = arith.divf %238, %239 : vector<1x64xf32>
    %241 = vector.extract_strided_slice %240 {offsets = [0, 0], sizes = [1, 32], strides = [1, 1]} : vector<1x64xf32> to vector<1x32xf32>
    %242 = vector.extract_strided_slice %240 {offsets = [0, 32], sizes = [1, 32], strides = [1, 1]} : vector<1x64xf32> to vector<1x32xf32>
    %243 = arith.mulf %241, %241 : vector<1x32xf32>
    %244 = arith.subf %242, %243 : vector<1x32xf32>
    %245 = vector.broadcast %241 : vector<1x32xf32> to vector<16x32xf32>
    %246 = arith.subf %234, %245 : vector<16x32xf32>
    %cst_95 = arith.constant 9.99999974E-6 : f32
    %247 = vector.broadcast %cst_95 : f32 to vector<1x32xf32>
    %248 = arith.addf %244, %247 : vector<1x32xf32>
    %249 = math.rsqrt %248 : vector<1x32xf32>
    %250 = vector.broadcast %249 : vector<1x32xf32> to vector<16x32xf32>
    %251 = arith.mulf %246, %250 : vector<16x32xf32>
    %252 = vector.broadcast %232 : vector<1x32xf32> to vector<16x32xf32>
    %253 = arith.mulf %251, %252 : vector<16x32xf32>
    %254 = vector.broadcast %233 : vector<1x32xf32> to vector<16x32xf32>
    %255 = arith.addf %253, %254 : vector<16x32xf32>
    %c0_96 = arith.constant 0 : index
    %c0_97 = arith.constant 0 : index
    %256 = vector.load %arg30[%c0_96, %c0_97] : memref<16x32xf32, #tpu.memory_space<vmem>>, vector<16x32xf32>
    tpu.vector_store %arg30[%c0_96, %c0_97], %255 {strides = array<i32>} : memref<16x32xf32, #tpu.memory_space<vmem>>, vector<16x32xf32>,
    return
  }
}

</mosaic_0001>

<bundles_post_ra>
// kernel: tile.13
= control target key start
LH: loop header
LB: loop body
LE: loop exit
PB: predicated region body
PF: predicated region fallthrough
CT: control target
= control target key end

     0   :  { %s154_s0 = inlined_call_operand.vmem [shape: f32[8,8], index: 0, kind: input, shape index: {}]   ;;  %s155_s1 = inlined_call_operand.vmem [shape: f32[2,8,4,8], index: 1, kind: output, shape index: {}]  }
   0x1   :  { %v4_v0 = vld [vmem:[%s154_s0] ss:$0 sm:$0xff]  ;;  %v51_v1 = vld [vmem:[%s154_s0 + $0x1] ss:$0 sm:$0xff]  ;;  %v54_v2 = vld [vmem:[%s154_s0 + $0x2] ss:$0 sm:$0xff] }
   0x2   :  { %5 = vst [vmem:[%s155_s1] sm:$0xf] %v4_v0  ;;  %50 = vst [vmem:[%s155_s1 + $0x20] sm:$0xf] %v4_v0  ;;  %v57_v3 = vld [vmem:[%s154_s0 + $0x3] ss:$0 sm:$0xff] }
   0x3   :  { %52 = vst [vmem:[%s155_s1 + $0x4] sm:$0xf] %v51_v1  ;;  %53 = vst [vmem:[%s155_s1 + $0x24] sm:$0xf] %v51_v1  ;;  %v60_v4 = vld [vmem:[%s154_s0 + $0x4] ss:$0 sm:$0xff] }
   0x4   :  { %55 = vst [vmem:[%s155_s1 + $0x8] sm:$0xf] %v54_v2  ;;  %56 = vst [vmem:[%s155_s1 + $0x28] sm:$0xf] %v54_v2  ;;  %v63_v5 = vld [vmem:[%s154_s0 + $0x5] ss:$0 sm:$0xff] }
   0x5   :  { %58 = vst [vmem:[%s155_s1 + $0xc] sm:$0xf] %v57_v3  ;;  %59 = vst [vmem:[%s155_s1 + $0x2c] sm:$0xf] %v57_v3  ;;  %v66_v6 = vld [vmem:[%s154_s0 + $0x6] ss:$0 sm:$0xff] }
   0x6   :  { %61 = vst [vmem:[%s155_s1 + $0x10] sm:$0xf] %v60_v4  ;;  %62 = vst [vmem:[%s155_s1 + $0x30] sm:$0xf] %v60_v4  ;;  %v69_v7 = vld [vmem:[%s154_s0 + $0x7] ss:$0 sm:$0xff] }
   0x7   :  { %64 = vst [vmem:[%s155_s1 + $0x14] sm:$0xf] %v63_v5  ;;  %65 = vst [vmem:[%s155_s1 + $0x34] sm:$0xf] %v63_v5 }
   0x8   :  { %67 = vst [vmem:[%s155_s1 + $0x18] sm:$0xf] %v66_v6  ;;  %68 = vst [vmem:[%s155_s1 + $0x38] sm:$0xf] %v66_v6 }
   0x9   :  { %70 = vst [vmem:[%s155_s1 + $0x1c] sm:$0xf] %v69_v7  ;;  %71 = vst [vmem:[%s155_s1 + $0x3c] sm:$0xf] %v69_v7 }

// kernel: tile.14
= control target key start
LH: loop header
LB: loop body
LE: loop exit
PB: predicated region body
PF: predicated region fallthrough
CT: control target
= control target key end

     0   :  { %vm82_vm0 = vcmask 1047556   ;;  %vm84_vm1 = vcmask 64512   ;;  %s195_s9 = smov 24   ;;  %s196_s14 = smov 8   ;;  %vm103_vm2 = vcmask 261312   ;;  %vm124_vm3 = vcmask 195712   ;;  %s289_s0 = inlined_call_operand.vmem [shape: f32[2,8,4,8], index: 0, kind: input, shape index: {}]   ;;  %s290_s1 = inlined_call_operand.vmem [shape: f32[16,32], index: 1, kind: output, shape index: {}]  }
   0x1   :  { %v180_v0 = vld [vmem:[%s289_s0 + $0x1c] sm:$0xf]  ;;  %v181_v1 = vld [vmem:[%s289_s0 + $0x18] sm:$0xf]  ;;  %v182_v2 = vld [vmem:[%s289_s0 + $0x14] sm:$0xf] }
   0x2   :  { %48 = vst [vmem:[#allocation0 + $0x38] sm:$0xf] %v180_v0  ;;  %53 = vst [vmem:[#allocation0 + $0x30] sm:$0xf] %v181_v1  ;;  %v183_v3 = vld [vmem:[%s289_s0 + $0x10] sm:$0xf] }
   0x3   :  { %58 = vst [vmem:[#allocation0 + $0x28] sm:$0xf] %v182_v2  ;;  %v184_v4 = vld [vmem:[%s289_s0 + $0xc] sm:$0xf]  ;;  %v185_v5 = vld [vmem:[%s289_s0 + $0x8] sm:$0xf] }
   0x4   :  { %63 = vst [vmem:[#allocation0 + $0x20] sm:$0xf] %v183_v3  ;;  %68 = vst [vmem:[#allocation0 + $0x18] sm:$0xf] %v184_v4  ;;  %v186_v6 = vld [vmem:[%s289_s0 + $0x4] sm:$0xf] }
   0x5   :  { %73 = vst [vmem:[#allocation0 + $0x10] sm:$0xf] %v185_v5  ;;  %v78_v7 = vld [vmem:[%s289_s0] sm:$0xf]  ;;  %77 = vst [vmem:[#allocation0 + $0x8] sm:$0xf] %v186_v6 }
   0x6   :  { %79 = vst [vmem:[#allocation0] sm:$0xf] %v78_v7  ;;  %v172_v8 = vld [vmem:[%s289_s0 + $0x3c] sm:$0xf]  ;;  %v173_v9 = vld [vmem:[%s289_s0 + $0x38] sm:$0xf] }
   0x7   :  { %8 = vst [vmem:[#allocation0 + $0x78] sm:$0xf] %v172_v8  ;;  %13 = vst [vmem:[#allocation0 + $0x70] sm:$0xf] %v173_v9  ;;  %v174_v10 = vld [vmem:[%s289_s0 + $0x34] sm:$0xf] }
   0x8   :  { %v175_v11 = vld [vmem:[%s289_s0 + $0x30] sm:$0xf]  ;;  %v176_v12 = vld [vmem:[%s289_s0 + $0x2c] sm:$0xf]  ;;  %18 = vst [vmem:[#allocation0 + $0x68] sm:$0xf] %v174_v10 }
   0x9   :  { %23 = vst [vmem:[#allocation0 + $0x60] sm:$0xf] %v175_v11  ;;  %28 = vst [vmem:[#allocation0 + $0x58] sm:$0xf] %v176_v12  ;;  %v177_v13 = vld [vmem:[%s289_s0 + $0x28] sm:$0xf] }
   0xa   :  { %v178_v14 = vld [vmem:[%s289_s0 + $0x24] sm:$0xf]  ;;  %v179_v15 = vld [vmem:[%s289_s0 + $0x20] sm:$0xf]  ;;  %33 = vst [vmem:[#allocation0 + $0x50] sm:$0xf] %v177_v13 }
   0xb   :  { %38 = vst [vmem:[#allocation0 + $0x48] sm:$0xf] %v178_v14  ;;  %43 = vst [vmem:[#allocation0 + $0x40] sm:$0xf] %v179_v15  ;;  %s194_s0 = smov 16   ;;  %vm145_vm4 = vcmask 130112  }
   0xc   :  { %v119_v16 = vld [vmem:[#allocation0 + $0x2] ss:$8 sm:$0xf0]   ;;  %v98_v17 = vld [vmem:[#allocation0 + $0x3] ss:$8 sm:$0xf0]  }
   0xd   :  { %v117_v18 = vld [vmem:[#allocation0 + $0x2] ss:$8 sm:$0xf]   ;;  %v96_v19 = vld [vmem:[#allocation0 + $0x3] ss:$8 sm:$0xf]  }
   0xe   :  { %v121_v20 = vsel %vm82_vm0, %v119_v16, %v117_v18  ;;  %v100_v21 = vsel %vm82_vm0, %v98_v17, %v96_v19  ;;  %v138_v24 = vld [vmem:[#allocation0 + $0x1] ss:$8 sm:$0xf]   ;;  %v80_v32 = vld [vmem:[#allocation0] ss:$8 sm:$0xf]  }
   0xf   :  { %122 = vrot.lane.b32.xlu1 %v121_v20, %s194_s0  ;;  %101 = vrot.lane.b32.xlu0 %v100_v21, %s195_s9  ;;  %v140_v25 = vld [vmem:[#allocation0 + $0x1] ss:$8 sm:$0xf0]   ;;  %v81_v33 = vld [vmem:[#allocation0] ss:$8 sm:$0xf0]  }
  0x10   :  { %v129_v22 = vld [vmem:[#allocation0 + $0x42] ss:$8 sm:$0xf0]   ;;  %v108_v23 = vld [vmem:[#allocation0 + $0x43] ss:$8 sm:$0xf0]   ;;  %v83_v34 = vsel %vm82_vm0, %v81_v33, %v80_v32  ;;  %v142_v38 = vsel %vm82_vm0, %v140_v25, %v138_v24 }
  0x11   :  { %v150_v31 = vld [vmem:[#allocation0 + $0x41] ss:$8 sm:$0xf0]   ;;  %v89_v36 = vld [vmem:[#allocation0 + $0x40] ss:$8 sm:$0xf0]  }
  0x12   :  { %v127_v26 = vld [vmem:[#allocation0 + $0x42] ss:$8 sm:$0xf]   ;;  %v106_v27 = vld [vmem:[#allocation0 + $0x43] ss:$8 sm:$0xf]  }
  0x13   :  { %v131_v28 = vsel %vm82_vm0, %v129_v22, %v127_v26  ;;  %v110_v29 = vsel %vm82_vm0, %v108_v23, %v106_v27  ;;  %v148_v30 = vld [vmem:[#allocation0 + $0x41] ss:$8 sm:$0xf]   ;;  %v87_v35 = vld [vmem:[#allocation0 + $0x40] ss:$8 sm:$0xf]  }
  0x14   :  { %132 = vrot.lane.b32.xlu1 %v131_v28, %s194_s0  ;;  %111 = vrot.lane.b32.xlu0 %v110_v29, %s195_s9  ;;  %v152_v37 = vsel %vm82_vm0, %v150_v31, %v148_v30  ;;  %85 = vst.msk [vmem:[%s290_s1] sm:$0xff] %vm84_vm1, %v83_v34   ;;  %v91_v39 = vsel %vm82_vm0, %v89_v36, %v87_v35 }
  0x15   :  { %187 = vst.msk [vmem:[%s290_s1 + $0x8] sm:$0xff] %vm84_vm1, %v91_v39  }
  0x18   :  { %153 = vrot.lane.b32.xlu1 %v152_v37, %s196_s14  ;;  %143 = vrot.lane.b32.xlu0 %v142_v38, %s196_s14 }
  0x81   :  { %v123_v40 = vpop.permute.xlu1 %122   ;;  %v102_v41 = vpop.permute.xlu0 %101  }
  0x82   :  { %104 = vst.msk [vmem:[%s290_s1] sm:$0xff] %vm103_vm2, %v102_v41  }
  0x83   :  { %125 = vst.msk [vmem:[%s290_s1] sm:$0xff] %vm124_vm3, %v123_v40  }
  0x86   :  { %v133_v42 = vpop.permute.xlu1 %132   ;;  %v112_v43 = vpop.permute.xlu0 %111  }
  0x87   :  { %188 = vst.msk [vmem:[%s290_s1 + $0x8] sm:$0xff] %vm103_vm2, %v112_v43  }
  0x88   :  { %189 = vst.msk [vmem:[%s290_s1 + $0x8] sm:$0xff] %vm124_vm3, %v133_v42  }
  0x8a   :  { %v154_v44 = vpop.permute.xlu1 %153   ;;  %v144_v45 = vpop.permute.xlu0 %143  }
  0x8b   :  { %190 = vst.msk [vmem:[%s290_s1 + $0x8] sm:$0xff] %vm145_vm4, %v154_v44   ;;  %146 = vst.msk [vmem:[%s290_s1] sm:$0xff] %vm145_vm4, %v144_v45  }

// kernel: encoder_forward.1
= control target key start
LH: loop header
LB: loop body
LE: loop exit
PB: predicated region body
PF: predicated region fallthrough
CT: control target
= control target key end

     0   :  { %s2229_s6 = smov 1   ;;  %s2230_s10 = smov 2   ;;  %s2809_s0 = inlined_call_operand.smem [shape: u32[31], index: -1, kind: input, shape index: {}] }
   0x1   :  { %s2275_s5 = sld [smem:[%s2809_s0]]   ;;  %s2231_s14 = smov 3  }
   0x2   :  { %s2280_s9 = sld [smem:[%s2809_s0 + %s2229_s6]]   ;;  %s2232_s18 = smov 4  }
   0x3   :  { %s2285_s13 = sld [smem:[%s2809_s0 + %s2230_s10]]   ;;  %s2233_s22 = smov 5  }
   0x4   :  { %s2290_s17 = sld [smem:[%s2809_s0 + %s2231_s14]]   ;;  %s2234_s26 = smov 6  }
   0x5   :  { %s2295_s21 = sld [smem:[%s2809_s0 + %s2232_s18]]   ;;  %s2235_s30 = smov 7  }
   0x6   :  { %s2300_s25 = sld [smem:[%s2809_s0 + %s2233_s22]]   ;;  %s2236_s4 = smov 8  }
   0x7   :  { %s2305_s29 = sld [smem:[%s2809_s0 + %s2234_s26]]   ;;  %s2237_s10 = smov 9  }
   0x8   :  { %s2310_s3 = sld [smem:[%s2809_s0 + %s2235_s30]]   ;;  %s2238_s15 = smov 10  }
   0x9   :  { %s2315_s8 = sld [smem:[%s2809_s0 + %s2236_s4]]   ;;  %s2239_s20 = smov 11  }
   0xa   :  { %s2320_s14 = sld [smem:[%s2809_s0 + %s2237_s10]]   ;;  %s2240_s26 = smov 12  }
   0xb   :  { %s2325_s19 = sld [smem:[%s2809_s0 + %s2238_s15]]   ;;  %s2241_s1 = smov 13  }
   0xc   :  { %s2330_s24 = sld [smem:[%s2809_s0 + %s2239_s20]]   ;;  %s2242_s7 = smov 14  }
   0xd   :  { %s2335_s30 = sld [smem:[%s2809_s0 + %s2240_s26]]   ;;  %s2243_s15 = smov 15  }
   0xe   :  { %s2340_s6 = sld [smem:[%s2809_s0 + %s2241_s1]]   ;;  %s2244_s22 = smov 16  }
   0xf   :  { %s2345_s12 = sld [smem:[%s2809_s0 + %s2242_s7]]   ;;  %s2245_s28 = smov 17  }
  0x10   :  { %s2350_s20 = sld [smem:[%s2809_s0 + %s2243_s15]]   ;;  %s2246_s7 = smov 18  }
  0x11   :  { %s2355_s27 = sld [smem:[%s2809_s0 + %s2244_s22]]   ;;  %s2247_s15 = smov 19  }
  0x12   :  { %s2360_s4 = sld [smem:[%s2809_s0 + %s2245_s28]]   ;;  %s2248_s22 = smov 20  }
  0x13   :  { %s2249_s28 = smov 21  }
  0x14   :  { %2814 = sst [smem:[#allocation5_spill]] %s2340_s6 }
  0x15   :  { %s2365_s6 = sld [smem:[%s2809_s0 + %s2246_s7]]   ;;  %s2250_s7 = smov 22  }
  0x16   :  { %2815 = sst [smem:[#allocation6_spill]] %s2350_s20 }
  0x17   :  { %2816 = sst [smem:[#allocation7_spill]] %s2355_s27 }
  0x18   :  { %2817 = sst [smem:[#allocation8_spill]] %s2360_s4 }
  0x19   :  { %s2370_s20 = sld [smem:[%s2809_s0 + %s2247_s15]]   ;;  %s2251_s15 = smov 23  }
  0x1a   :  { %s2375_s27 = sld [smem:[%s2809_s0 + %s2248_s22]]   ;;  %s2252_s22 = smov 24  }
  0x1b   :  { %2818 = sst [smem:[#allocation9_spill]] %s2365_s6 }
  0x1c   :  { %s2380_s4 = sld [smem:[%s2809_s0 + %s2249_s28]]   ;;  %s2253_s28 = smov 25  }
  0x1d   :  { %s2385_s6 = sld [smem:[%s2809_s0 + %s2250_s7]]   ;;  %s2254_s7 = smov 26  }
  0x1f   :  { %2819 = sst [smem:[#allocation10_spill]] %s2370_s20 }
  0x20   :  { %2820 = sst [smem:[#allocation11_spill]] %s2375_s27 }
  0x21   :  { %s2390_s20 = sld [smem:[%s2809_s0 + %s2251_s15]]   ;;  %s2255_s15 = smov 27  }
  0x22   :  { %2821 = sst [smem:[#allocation12_spill]] %s2380_s4 }
  0x23   :  { %2822 = sst [smem:[#allocation13_spill]] %s2385_s6 }
  0x24   :  { %s2395_s27 = sld [smem:[%s2809_s0 + %s2252_s22]]   ;;  %s2256_s22 = smov 28  }
  0x25   :  { %s2400_s4 = sld [smem:[%s2809_s0 + %s2253_s28]]   ;;  %s2257_s28 = smov 29  }
  0x26   :  { %s2405_s6 = sld [smem:[%s2809_s0 + %s2254_s7]]   ;;  %s2258_s7 = smov 30  }
  0x27   :  { %2823 = sst [smem:[#allocation14_spill]] %s2390_s20 }
  0x28   :  { %s2410_s20 = sld [smem:[%s2809_s0 + %s2255_s15]]  }
  0x2a   :  { %2824 = sst [smem:[#allocation15_spill]] %s2395_s27 }
  0x2b   :  { %2825 = sst [smem:[#allocation16_spill]] %s2400_s4 }
  0x2c   :  { %2826 = sst [smem:[#allocation17_spill]] %s2405_s6 }
  0x2d   :  { %s2415_s27 = sld [smem:[%s2809_s0 + %s2256_s22]]  }
  0x2e   :  { %s2420_s4 = sld [smem:[%s2809_s0 + %s2257_s28]]  }
  0x2f   :  { %s2425_s6 = sld [smem:[%s2809_s0 + %s2258_s7]]  }
  0x30   :  { %v2091_v0 = vld [vmem:[%s2305_s29] sm:$0xff]   ;;  %v2259_v1 = vmov 0.0   ;;  %v2092_v2 = vld [vmem:[%s2305_s29 + $0x8] sm:$0xff]   ;;  %vm2260_vm0 = vmmov 0   ;;  %vm186_vm1 = vcmask 261120   ;;  %v2453_v8 = vld [vmem:[%s2280_s9 + $0x10] sm:$0xff]  }
  0x31   :  { %1907 = vmatprep.subr.bf16.mxu0 %v2259_v1  ;;  %1915 = vmatprep.subr.bf16.mxu1 %v2259_v1  ;;  %v2434_v3 = vld [vmem:[%s2275_s5] sm:$0xff]  ;;  %v2437_v4 = vld [vmem:[%s2275_s5 + $0x8] sm:$0xff]  ;;  %v2459_v9 = vld [vmem:[%s2280_s9 + $0x18] sm:$0xff]  }
  0x32   :  { %1908 = vmatpush3.bf16.msra.mxu0 %v2091_v0  ;;  %1911 = vmatprep.mubr.msk.bf16.mxu0 %vm2260_vm0, %v2259_v1  ;;  %v2441_v5 = vld [vmem:[%s2280_s9] sm:$0xff]   ;;  %v162_v6 = vpack.c.bf16 %v2437_v4, %v2434_v3  ;;  %v2449_v7 = vld [vmem:[%s2280_s9 + $0x8] sm:$0xff]  }
  0x33   :  { %1909 = vmatprep.subr.bf16.mxu0 %v2259_v1  ;;  %1927 = vmatprep.mubr.msk.bf16.mxu1 %vm2260_vm0, %v2259_v1 }
  0x34   :  { %1916 = vmatpush3.bf16.msra.mxu1 %v2441_v5 }
  0x35   :  { %1917 = vmatprep.subr.bf16.mxu1 %v2259_v1 }
  0x36   :  { %1910 = vmatpush3.bf16.msra.mxu0 %v2092_v2 }
  0x38   :  { %1918 = vmatpush3.bf16.msra.mxu1 %v2449_v7 }
  0x39   :  { %1912 = vmatmul.mubr.msk.bf16.vlgmr.msra.gmra.mrb[0].mxu0 %vm186_vm1, %v162_v6  ;;  %1919 = vmatprep.subr.bf16.mxu1 %v2259_v1 }
  0x3c   :  { %1920 = vmatpush3.bf16.msra.mxu1 %v2453_v8 }
  0x3d   :  { %1921 = vmatprep.subr.bf16.mxu1 %v2259_v1 }
  0x40   :  { %1922 = vmatpush3.bf16.msra.mxu1 %v2459_v9 }
  0x41   :  { %1923 = vmatprep.subr.bf16.mxu1 %v2259_v1 }
  0x42   :  { %66 = vsyncpa [#allocation3], 0  ;;  %v2466_v10 = vld [vmem:[%s2280_s9 + $0x20] sm:$0xff]   ;;  %v2471_v11 = vld [vmem:[%s2280_s9 + $0x28] sm:$0xff]   ;;  %vm270_vm2 = vcmask 785408   ;;  %s2261_s0 = smov 96  }
  0x43   :  { %v1777_v12 = vld [vmem:[%s2310_s3] ss:$0 sm:$0xff]  ;;  %v2486_v22 = vld [vmem:[%s2285_s13 + $0x8] sm:$0xff]  ;;  %v2499_v34 = vld [vmem:[%s2295_s21 + $0x10] sm:$0xff]  ;;  %vm415_vm3 = vcmask 130048   ;;  %s2262_s5 = smov 64  }
  0x44   :  { %1924 = vmatpush3.bf16.msra.mxu1 %v2466_v10  ;;  %v2480_v20 = vld [vmem:[%s2285_s13] sm:$0xff]  ;;  %v2489_v24 = vld [vmem:[%s2290_s17 + $0x8] sm:$0xff]  ;;  %v2508_v37 = vld [vmem:[%s2295_s21 + $0x18] sm:$0xff]  ;;  %s2263_s9 = smov 32   ;;  %vm686_vm4 = vcmask 523264   ;;  %s2827_s13 = sld [smem:[#allocation5_spill]] }
  0x45   :  { %1925 = vmatprep.subr.bf16.mxu1 %v2259_v1  ;;  %v2483_v21 = vld [vmem:[%s2290_s17] sm:$0xff]  ;;  %v2505_v36 = vld [vmem:[%s2295_s21 + $0x8] sm:$0xff]  ;;  %v2514_v40 = vld [vmem:[%s2295_s21 + $0x30] sm:$0xff]  ;;  %s2828_s17 = sld [smem:[#allocation6_spill]]  ;;  %s2830_s29 = sld [smem:[#allocation7_spill]] }
  0x46   :  { %v2496_v33 = vld [vmem:[%s2295_s21] sm:$0xff]  ;;  %v2511_v38 = vld [vmem:[%s2295_s21 + $0x28] sm:$0xff]  ;;  %v2517_v41 = vld [vmem:[%s2295_s21 + $0x38] sm:$0xff]  ;;  %s2831_s3 = sld [smem:[#allocation8_spill]] }
  0x47   :  { %v2502_v35 = vld [vmem:[%s2295_s21 + $0x20] sm:$0xff]  ;;  %v2538_v57 = vld [vmem:[%s2300_s25 + $0x10] sm:$0xff]  ;;  %v2544_v60 = vld [vmem:[%s2300_s25 + $0x18] sm:$0xff]  ;;  %s2839_s15 = sld [smem:[#allocation16_spill]] }
  0x48   :  { %1926 = vmatpush3.bf16.msra.mxu1 %v2471_v11  ;;  %v2541_v58 = vld [vmem:[%s2300_s25] sm:$0xff] }
  0x49   :  { %1951 = vmatprep.subr.bf16.mxu1 %v2259_v1 }
 0x10c   :  { %v224_v13 = vpop.f32.mrb[0].mxu0 }
 0x10d   :  { %v1913_v14 = vpop.f32.mrb[1].mxu0  ;;  %v225_v16 = vadd.f32 %v1777_v12, %v224_v13  ;;  %v2551_v13 = vld [vmem:[%s2300_s25 + $0x8] sm:$0xff] }
 0x10e   :  { %v227_v15 = vpop.f32.mrb[2].mxu0 }
 0x10f   :  { %v228_v17 = vadd.f32 %v1777_v12, %v227_v15  ;;  %v1914_v18 = vpop.f32.mrb[3].mxu0  ;;  %v231_v25 = vmul.f32 %v225_v16, %v2480_v20 }
 0x111   :  { %v233_v19 = vpack.c.bf16 %v228_v17, %v225_v16  ;;  %v232_v29 = vmul.f32 %v228_v17, %v2486_v22  ;;  %v2557_v17 = vld [vmem:[%s2300_s25 + $0x30] sm:$0xff] }
 0x113   :  { %1928 = vmatmul.mubr.msk.bf16.vlgmr.msra.gmra.mrb[0].mxu1 %vm270_vm2, %v233_v19 }
 0x114   :  { %1955 = vmatprep.mubr.msk.bf16.mxu1 %vm2260_vm0, %v2259_v1 }
 0x1e6   :  { %v308_v23 = vpop.f32.mrb[0].mxu1 }
 0x1e7   :  { %v315_v26 = vmul.f32 %v308_v23, %v2483_v21  ;;  %v1929_v27 = vpop.f32.mrb[1].mxu1 }
 0x1e8   :  { %v311_v28 = vpop.f32.mrb[2].mxu1 }
 0x1e9   :  { %v317_v30 = vadd.f32 %v315_v26, %v231_v25  ;;  %v316_v31 = vmul.f32 %v311_v28, %v2489_v24  ;;  %v1930_v32 = vpop.f32.mrb[3].mxu1  ;;  %v2562_v28 = vld [vmem:[%s2300_s25 + $0x20] sm:$0xff] }
 0x1eb   :  { %v318_v39 = vadd.f32 %v316_v31, %v232_v29  ;;  %v320_v42 = vmul.f32 %v317_v30, %v2496_v33  ;;  %v322_v43 = vmul.f32 %v317_v30, %v2499_v34  ;;  %v324_v44 = vmul.f32 %v317_v30, %v2502_v35  ;;  %v2567_v31 = vld [vmem:[%s2300_s25 + $0x28] sm:$0xff] }
 0x1ec   :  { %v326_v49 = vmul.f32 %v317_v30, %v2514_v40 }
 0x1ed   :  { %v2522_v45 = vpack.c.bf16 %v318_v39, %v317_v30  ;;  %v321_v46 = vmul.f32 %v318_v39, %v2505_v36  ;;  %v323_v47 = vmul.f32 %v318_v39, %v2508_v37  ;;  %v325_v48 = vmul.f32 %v318_v39, %v2511_v38 }
 0x1ee   :  { %v327_v50 = vmul.f32 %v318_v39, %v2517_v41 }
 0x1ef   :  { %333 = vrot.lane.b32.xlu0 %v2522_v45, %s2261_s0  ;;  %v328_v51 = vpack.c.bf16 %v321_v46, %v320_v42  ;;  %v329_v52 = vpack.c.bf16 %v323_v47, %v322_v43  ;;  %v330_v53 = vpack.c.bf16 %v325_v48, %v324_v44  ;;  %v2572_v42 = vld [vmem:[%s2300_s25 + $0x38] sm:$0xff]  ;;  %s2829_s25 = sld [smem:[#allocation9_spill]] }
 0x1f0   :  { %v331_v54 = vpack.c.bf16 %v327_v50, %v326_v49 }
 0x1f1   :  { %1933 = vmatprep.mubr.msk.bf16.mxu0 %vm186_vm1, %v328_v51 }
 0x261   :  { %v334_v55 = vpop.permute.xlu0 %333 }
 0x262   :  { %v348_v56 = vsel %vm186_vm1, %v334_v55, 0  ;;  %2051 = vmatprep.subr.msk.bf16.mxu0 %vm186_vm1, %v334_v55 }
 0x263   :  { %1932 = vmatpush3.bf16.xpose.msra.mxu0 %v348_v56 }
 0x26a   :  { %1934 = vmatmul.mubr.msk.bf16.vlgmr.msra.gmra.mrb[4].mxu0 %vm186_vm1, %v329_v52 }
 0x26b   :  { %1937 = vmatprep.mubr.msk.bf16.mxu0 %vm186_vm1, %v330_v53 }
 0x272   :  { %1938 = vmatmul.mubr.msk.bf16.gmra.mrb[8].mxu0 %vm186_vm1, %v331_v54 }
 0x33d   :  { %v1935_v59 = vpop.f32.mrb[4].mxu0 }
 0x33e   :  { %v393_v61 = vadd.f32 %v1935_v59, %v2538_v57  ;;  %v384_v62 = vpop.f32.mrb[5].mxu0 }
 0x33f   :  { %v385_v63 = vadd.f32 %v384_v62, %v2541_v58  ;;  %v1936_v0 = vpop.f32.mrb[6].mxu0 }
 0x340   :  { %v396_v2 = vadd.f32 %v1936_v0, %v2544_v60  ;;  %v387_v6 = vpop.f32.mrb[7].mxu0  ;;  %v422_v12 = vsel %vm415_vm3, %v393_v61, -inf }
 0x341   :  { %423 = vmax.xlane.f32.xlu1 %v422_v12  ;;  %v416_v14 = vsel %vm415_vm3, %v385_v63, -inf  ;;  %v388_v15 = vadd.f32 %v387_v6, %v2551_v13 }
 0x342   :  { %417 = vmax.xlane.f32.xlu0 %v416_v14  ;;  %v425_v16 = vsel %vm415_vm3, %v396_v2, -inf }
 0x343   :  { %v419_v27 = vsel %vm415_vm3, %v388_v15, -inf }
 0x345   :  { %426 = vmax.xlane.f32.xlu1 %v425_v16  ;;  %v1939_v18 = vpop.f32.mrb[8].mxu0 }
 0x346   :  { %v400_v19 = vpop.f32.mrb[9].mxu0  ;;  %v409_v25 = vadd.f32 %v1939_v18, %v2557_v17 }
 0x347   :  { %v1940_v23 = vpop.f32.mrb[10].mxu0  ;;  %v401_v29 = vadd.f32 %v400_v19, %v2562_v28 }
 0x348   :  { %v403_v26 = vpop.f32.mrb[11].mxu0  ;;  %v434_v30 = vsel %vm415_vm3, %v409_v25, -inf  ;;  %v412_v43 = vadd.f32 %v1940_v23, %v2572_v42 }
 0x349   :  { %420 = vmax.xlane.f32.xlu1 %v419_v27  ;;  %v404_v32 = vadd.f32 %v403_v26, %v2567_v31  ;;  %v428_v39 = vsel %vm415_vm3, %v401_v29, -inf }
 0x34a   :  { %v437_v46 = vsel %vm415_vm3, %v412_v43, -inf }
 0x34b   :  { %v431_v44 = vsel %vm415_vm3, %v404_v32, -inf }
 0x34d   :  { %435 = vmax.xlane.f32.xlu1 %v434_v30 }
 0x351   :  { %429 = vmax.xlane.f32.xlu1 %v428_v39 }
 0x355   :  { %432 = vmax.xlane.f32.xlu1 %v431_v44 }
 0x359   :  { %438 = vmax.xlane.f32.xlu1 %v437_v46 }
 0x3ce   :  { %v424_v47 = vpop.xlane.xlu1 %423 }
 0x3cf   :  { %v442_v48 = vsub.f32 %v393_v61, %v424_v47  ;;  %v418_v49 = vpop.xlane.xlu0 %417 }
 0x3d0   :  { %v440_v50 = vsub.f32 %v385_v63, %v418_v49 }
 0x3d1   :  { %v452_v51 = vmul.f32 1.442695, %v442_v48 }
 0x3d2   :  { %v448_v52 = vmul.f32 1.442695, %v440_v50  ;;  %v427_v53 = vpop.xlane.xlu1 %426 }
 0x3d3   :  { %2117 = vpow2.f32 %v452_v51  ;;  %v443_v54 = vsub.f32 %v396_v2, %v427_v53 }
 0x3d4   :  { %2119 = vpow2.f32 %v448_v52 }
 0x3d5   :  { %v454_v59 = vmul.f32 1.442695, %v443_v54 }
 0x3d6   :  { %v421_v55 = vpop.xlane.xlu1 %420 }
 0x3d7   :  { %v441_v56 = vsub.f32 %v388_v15, %v421_v55 }
 0x3d9   :  { %v450_v62 = vmul.f32 1.442695, %v441_v56 }
 0x3da   :  { %v436_v0 = vpop.xlane.xlu1 %435 }
 0x3db   :  { %2121 = vpow2.f32 %v450_v62  ;;  %v446_v6 = vsub.f32 %v409_v25, %v436_v0 }
 0x3dc   :  { %2123 = vpow2.f32 %v454_v59 }
 0x3dd   :  { %v2577_v12 = vpop.eup %2117  ;;  %v460_v14 = vmul.f32 1.442695, %v446_v6 }
 0x3de   :  { %v2120_v61 = vpop.eup %2119  ;;  %v430_v16 = vpop.xlane.xlu1 %429  ;;  %v470_v63 = vsel %vm415_vm3, %v2577_v12, 0.0 }
 0x3df   :  { %2125 = vpow2.f32 %v460_v14  ;;  %v444_v18 = vsub.f32 %v401_v29, %v430_v16  ;;  %471 = vadd.xlane.f32.xlu0 %v470_v63  ;;  %v464_v2 = vsel %vm415_vm3, %v2120_v61, 0.0 }
 0x3e0   :  { %465 = vadd.xlane.f32.xlu1 %v464_v2 }
 0x3e1   :  { %v456_v15 = vmul.f32 1.442695, %v444_v18 }
 0x3e2   :  { %v433_v19 = vpop.xlane.xlu1 %432 }
 0x3e3   :  { %2127 = vpow2.f32 %v456_v15  ;;  %v445_v23 = vsub.f32 %v404_v32, %v433_v19 }
 0x3e5   :  { %v2122_v25 = vpop.eup %2121  ;;  %v458_v26 = vmul.f32 1.442695, %v445_v23 }
 0x3e6   :  { %v439_v27 = vpop.xlane.xlu1 %438  ;;  %v467_v30 = vsel %vm415_vm3, %v2122_v25, 0.0  ;;  %v2124_v39 = vpop.eup %2123 }
 0x3e7   :  { %2129 = vpow2.f32 %v458_v26  ;;  %v447_v44 = vsub.f32 %v412_v43, %v439_v27  ;;  %468 = vadd.xlane.f32.xlu1 %v467_v30  ;;  %v473_v48 = vsel %vm415_vm3, %v2124_v39, 0.0 }
 0x3e9   :  { %v2126_v46 = vpop.eup %2125  ;;  %v462_v47 = vmul.f32 1.442695, %v447_v44 }
 0x3ea   :  { %v482_v29 = vsel %vm415_vm3, %v2126_v46, 0.0 }
 0x3eb   :  { %2131 = vpow2.f32 %v462_v47  ;;  %483 = vadd.xlane.f32.xlu0 %v482_v29  ;;  %474 = vadd.xlane.f32.xlu1 %v473_v48 }
 0x3ed   :  { %v2128_v49 = vpop.eup %2127 }
 0x3ee   :  { %v476_v32 = vsel %vm415_vm3, %v2128_v49, 0.0 }
 0x3ef   :  { %477 = vadd.xlane.f32.xlu0 %v476_v32 }
 0x3f1   :  { %v2130_v50 = vpop.eup %2129 }
 0x3f2   :  { %v479_v51 = vsel %vm415_vm3, %v2130_v50, 0.0 }
 0x3f3   :  { %480 = vadd.xlane.f32.xlu1 %v479_v51  ;;  %v2099_v51 = vld [vmem:[%s2315_s8] sm:$0xff]  }
 0x3f4   :  { %1952 = vmatpush3.bf16.msra.mxu1 %v2099_v51 }
 0x3f5   :  { %v2132_v52 = vpop.eup %2131  ;;  %1953 = vmatprep.subr.bf16.mxu1 %v2259_v1 }
 0x3f6   :  { %v485_v43 = vsel %vm415_vm3, %v2132_v52, 0.0 }
 0x3f7   :  { %486 = vadd.xlane.f32.xlu1 %v485_v43  ;;  %v2100_v43 = vld [vmem:[%s2315_s8 + $0x8] sm:$0xff]   ;;  %s2832_s8 = sld [smem:[#allocation10_spill]] }
 0x3f8   :  { %1954 = vmatpush3.bf16.msra.mxu1 %v2100_v43 }
 0x3f9   :  { %1959 = vmatprep.subr.bf16.mxu1 %v2259_v1 }
 0x405   :  { %508 = vrot.lane.b32.xlu0 %v2522_v45, %s2262_s5 }
 0x46c   :  { %v472_v54 = vpop.xlane.xlu0 %471 }
 0x46d   :  { %v466_v53 = vpop.xlane.xlu1 %465 }
 0x46e   :  { %2133 = vrcp.f32 %v466_v53 }
 0x474   :  { %v469_v55 = vpop.xlane.xlu1 %468 }
 0x475   :  { %2135 = vrcp.f32 %v469_v55 }
 0x476   :  { %2137 = vrcp.f32 %v472_v54 }
 0x478   :  { %v475_v56 = vpop.xlane.xlu1 %474  ;;  %v484_v59 = vpop.xlane.xlu0 %483 }
 0x479   :  { %2139 = vrcp.f32 %v475_v56  ;;  %v2134_v0 = vpop.eup %2133 }
 0x47a   :  { %v496_v63 = vmul.f32 %v2134_v0, %v2120_v61 }
 0x47c   :  { %v478_v62 = vpop.xlane.xlu0 %477 }
 0x47d   :  { %2141 = vrcp.f32 %v478_v62 }
 0x47f   :  { %v2136_v6 = vpop.eup %2135 }
 0x480   :  { %v481_v14 = vpop.xlane.xlu1 %480  ;;  %v509_v16 = vpop.permute.xlu0 %508  ;;  %v497_v18 = vmul.f32 %v2136_v6, %v2122_v25 }
 0x481   :  { %v2138_v2 = vpop.eup %2137  ;;  %2143 = vrcp.f32 %v481_v14  ;;  %1941 = vmatprep.subr.bf16.mxu0 %v509_v16 }
 0x482   :  { %1942 = vmatpush3.bf16.msra.mxu0 %v509_v16  ;;  %v504_v45 = vpack.c.bf16 %v497_v18, %v496_v63  ;;  %2145 = vrcp.f32 %v484_v59  ;;  %v498_v19 = vmul.f32 %v2138_v2, %v2577_v12 }
 0x483   :  { %v2140_v15 = vpop.eup %2139  ;;  %1967 = vmatprep.subr.bf16.mxu0 %v2259_v1 }
 0x484   :  { %v499_v23 = vmul.f32 %v2140_v15, %v2124_v39  ;;  %1943 = vmatprep.mubr.msk.bf16.mxu0 %vm415_vm3, %v504_v45  ;;  %v487_v26 = vpop.xlane.xlu1 %486 }
 0x485   :  { %2147 = vrcp.f32 %v487_v26 }
 0x486   :  { %v505_v27 = vpack.c.bf16 %v499_v23, %v498_v19 }
 0x487   :  { %v2142_v61 = vpop.eup %2141 }
 0x488   :  { %1944 = vmatmul.mubr.msk.bf16.vlgmr.msra.gmra.mrb[12].mxu0 %vm415_vm3, %v505_v27  ;;  %v500_v30 = vmul.f32 %v2142_v61, %v2128_v49  ;;  %v1796_v61 = vld [vmem:[%s2320_s14] ss:$0 sm:$0xff]  ;;  %s2833_s14 = sld [smem:[#allocation11_spill]] }
 0x48b   :  { %v2144_v25 = vpop.eup %2143 }
 0x48c   :  { %v501_v44 = vmul.f32 %v2144_v25, %v2130_v50  ;;  %v2146_v47 = vpop.eup %2145 }
 0x48d   :  { %v502_v12 = vmul.f32 %v2146_v47, %v2126_v46 }
 0x48e   :  { %v506_v29 = vpack.c.bf16 %v501_v44, %v500_v30 }
 0x48f   :  { %v2148_v48 = vpop.eup %2147 }
 0x490   :  { %1947 = vmatprep.mubr.msk.bf16.mxu0 %vm415_vm3, %v506_v29  ;;  %v503_v39 = vmul.f32 %v2148_v48, %v2132_v52 }
 0x492   :  { %v507_v32 = vpack.c.bf16 %v503_v39, %v502_v12 }
 0x494   :  { %1948 = vmatmul.mubr.msk.bf16.gmra.mrb[16].mxu0 %vm415_vm3, %v507_v32 }
 0x495   :  { %1975 = vmatprep.mubr.msk.bf16.mxu0 %vm2260_vm0, %v2259_v1 }
 0x55b   :  { %v1945_v49 = vpop.f32.mrb[12].mxu0 }
 0x55c   :  { %v590_v50 = vmul.f32 %v1945_v49, %v2499_v34  ;;  %v557_v53 = vpop.f32.mrb[13].mxu0 }
 0x55d   :  { %v588_v46 = vmul.f32 %v557_v53, %v2496_v33  ;;  %v1946_v52 = vpop.f32.mrb[14].mxu0 }
 0x55e   :  { %v591_v54 = vmul.f32 %v1946_v52, %v2508_v37  ;;  %v560_v55 = vpop.f32.mrb[15].mxu0 }
 0x55f   :  { %v592_v56 = vadd.f32 %v590_v50, %v588_v46  ;;  %v589_v59 = vmul.f32 %v560_v55, %v2505_v36 }
 0x561   :  { %v593_v62 = vadd.f32 %v591_v54, %v589_v59 }
 0x567   :  { %v1949_v0 = vpop.f32.mrb[16].mxu0 }
 0x568   :  { %v573_v6 = vpop.f32.mrb[17].mxu0  ;;  %v598_v18 = vmul.f32 %v1949_v0, %v2514_v40 }
 0x569   :  { %v594_v14 = vmul.f32 %v573_v6, %v2502_v35  ;;  %v1950_v16 = vpop.f32.mrb[18].mxu0 }
 0x56a   :  { %v576_v63 = vpop.f32.mrb[19].mxu0  ;;  %v599_v19 = vmul.f32 %v1950_v16, %v2517_v41 }
 0x56b   :  { %v596_v2 = vadd.f32 %v594_v14, %v592_v56  ;;  %v595_v45 = vmul.f32 %v576_v63, %v2511_v38 }
 0x56d   :  { %v600_v15 = vadd.f32 %v598_v18, %v596_v2  ;;  %v597_v23 = vadd.f32 %v595_v45, %v593_v62  ;;  %v708_v18 = vlaneseq  ;;  %v2101_v2 = vld [vmem:[%s2335_s30] sm:$0xff]  }
 0x56f   :  { %v601_v26 = vadd.f32 %v599_v19, %v597_v23  ;;  %v709_v45 = vshrl.u32 %v708_v18, 7 }
 0x571   :  { %v602_v27 = vpack.c.bf16 %v601_v26, %v600_v15  ;;  %v2102_v15 = vld [vmem:[%s2335_s30 + $0x8] sm:$0xff]   ;;  %v2626_v19 = vsub.s32 0, %v709_v45  ;;  %s2837_s30 = sld [smem:[#allocation14_spill]] }
 0x573   :  { %1956 = vmatmul.mubr.msk.bf16.vlgmr.msra.gmra.mrb[4].mxu1 %vm186_vm1, %v602_v27 }
 0x574   :  { %1963 = vmatprep.mubr.msk.bf16.mxu1 %vm2260_vm0, %v2259_v1  ;;  %1960 = vmatpush3.bf16.msra.mxu1 %v2101_v2 }
 0x575   :  { %1961 = vmatprep.subr.bf16.mxu1 %v2259_v1 }
 0x578   :  { %1962 = vmatpush3.bf16.msra.mxu1 %v2102_v15 }
 0x579   :  { %1979 = vmatprep.subr.bf16.mxu1 %v2259_v1 }
 0x646   :  { %v663_v25 = vpop.f32.mrb[4].mxu1 }
 0x647   :  { %v664_v30 = vadd.f32 %v1796_v61, %v663_v25  ;;  %v1957_v44 = vpop.f32.mrb[5].mxu1  ;;  %v1800_v25 = vld [vmem:[%s2325_s19] ss:$0 sm:$0xff]  ;;  %s2834_s19 = sld [smem:[#allocation12_spill]] }
 0x648   :  { %v666_v47 = vpop.f32.mrb[6].mxu1 }
 0x649   :  { %v672_v29 = vadd.f32 %v664_v30, %v2434_v3  ;;  %v667_v48 = vadd.f32 %v1796_v61, %v666_v47  ;;  %v1958_v12 = vpop.f32.mrb[7].mxu1 }
 0x64b   :  { %v673_v39 = vadd.f32 %v667_v48, %v2437_v4  ;;  %v674_v32 = vmul.f32 %v672_v29, %v672_v29  ;;  %v1801_v48 = vld [vmem:[%s2330_s24] ss:$0 sm:$0xff]  ;;  %s2836_s24 = sld [smem:[#allocation13_spill]] }
 0x64d   :  { %678 = vrot.lane.b32.xlu1 %v674_v32, %s2263_s9  ;;  %v675_v51 = vmul.f32 %v673_v39, %v673_v39 }
 0x651   :  { %680 = vrot.lane.b32.xlu1 %v675_v51, %s2263_s9 }
 0x6bf   :  { %v679_v43 = vpop.permute.xlu1 %678 }
 0x6c0   :  { %v684_v49 = vsel %vm186_vm1, %v672_v29, %v679_v43 }
 0x6c1   :  { %v687_v3 = vsel %vm686_vm4, %v684_v49, 0.0 }
 0x6c3   :  { %v681_v50 = vpop.permute.xlu1 %680 }
 0x6c4   :  { %v685_v53 = vsel %vm186_vm1, %v673_v39, %v681_v50  ;;  %v2105_v50 = vld [vmem:[%s2345_s12 + $0x10] sm:$0xff]  }
 0x6c5   :  { %v688_v46 = vsel %vm686_vm4, %v685_v53, 0.0  ;;  %v2106_v53 = vld [vmem:[%s2345_s12 + $0x18] sm:$0xff]  }
 0x6c6   :  { %v689_v4 = vadd.f32 %v688_v46, %v687_v3  ;;  %v1802_v3 = vld [vmem:[%s2827_s13] ss:$0 sm:$0xff] }
 0x6c8   :  { %v690_v52 = vrot.slane %v689_v4, 4 }
 0x6ca   :  { %v691_v54 = vadd.f32 %v690_v52, %v689_v4 }
 0x6cc   :  { %v692_v55 = vrot.slane %v691_v54, 2 }
 0x6ce   :  { %v693_v56 = vadd.f32 %v692_v55, %v691_v54 }
 0x6d0   :  { %v694_v59 = vrot.slane %v693_v56, 1 }
 0x6d2   :  { %v695_v62 = vadd.f32 %v694_v59, %v693_v56 }
 0x6d4   :  { %v697_v0 = vmul.f32 0.0625, %v695_v62 }
 0x6d6   :  { %v698_v6 = vmul.f32 %v697_v0, %v697_v0  ;;  %v704_v27 = vsub.f32 %v672_v29, %v697_v0  ;;  %v705_v61 = vsub.f32 %v673_v39, %v697_v0  ;;  %v2103_v29 = vld [vmem:[%s2345_s12] sm:$0xff]   ;;  %v2104_v39 = vld [vmem:[%s2345_s12 + $0x8] sm:$0xff]   ;;  %s2838_s12 = sld [smem:[#allocation17_spill]] }
 0x6d7   :  { %1968 = vmatpush3.bf16.msra.mxu0 %v2103_v29 }
 0x6d8   :  { %700 = vrot.lane.b32.xlu0 %v698_v6, %s2263_s9  ;;  %1969 = vmatprep.subr.bf16.mxu0 %v2259_v1 }
 0x6db   :  { %1970 = vmatpush3.bf16.msra.mxu0 %v2104_v39 }
 0x6dc   :  { %1971 = vmatprep.subr.bf16.mxu0 %v2259_v1 }
 0x6df   :  { %1972 = vmatpush3.bf16.msra.mxu0 %v2105_v50 }
 0x6e0   :  { %1973 = vmatprep.subr.bf16.mxu0 %v2259_v1 }
 0x6e3   :  { %1974 = vmatpush3.bf16.msra.mxu0 %v2106_v53 }
 0x6e4   :  { %1987 = vmatprep.subr.bf16.mxu0 %v2259_v1 }
 0x74a   :  { %v701_v14 = vpop.permute.xlu0 %700 }
 0x74b   :  { %v703_v16 = vsub.f32 %v697_v0, %v701_v14 }
 0x74d   :  { %v706_v63 = vadd.f32 1e-05, %v703_v16 }
 0x74f   :  { %2149 = vrsqrt.f32 %v706_v63 }
 0x759   :  { %v2150_v23 = vpop.eup %2149 }
 0x75a   :  { %v711_v26 = vrot.slane %v2150_v23, %v2626_v19 }
 0x75c   :  { %713 = vrot.lane.b32.xlu1 %v711_v26, %s2261_s0 }
 0x7ce   :  { %v714_v30 = vpop.permute.xlu1 %713 }
 0x7cf   :  { %v716_v44 = vmul.f32 %v714_v30, %v704_v27  ;;  %v717_v47 = vmul.f32 %v714_v30, %v705_v61 }
 0x7d1   :  { %v724_v12 = vmul.f32 %v1800_v25, %v716_v44  ;;  %v725_v32 = vmul.f32 %v1800_v25, %v717_v47 }
 0x7d3   :  { %v2633_v51 = vadd.f32 %v1801_v48, %v724_v12  ;;  %v2635_v43 = vadd.f32 %v1801_v48, %v725_v32 }
 0x7d5   :  { %v734_v49 = vpack.c.bf16 %v2635_v43, %v2633_v51 }
 0x7d7   :  { %1964 = vmatmul.mubr.msk.bf16.vlgmr.msra.gmra.mrb[8].mxu1 %vm186_vm1, %v734_v49 }
 0x7d8   :  { %1983 = vmatprep.mubr.msk.bf16.mxu1 %vm2260_vm0, %v2259_v1 }
 0x8aa   :  { %v795_v46 = vpop.f32.mrb[8].mxu1 }
 0x8ab   :  { %v796_v4 = vadd.f32 %v1802_v3, %v795_v46  ;;  %v1965_v52 = vpop.f32.mrb[9].mxu1 }
 0x8ac   :  { %v798_v54 = vpop.f32.mrb[10].mxu1 }
 0x8ad   :  { %v804_v55 = vmul.f32 0.044715, %v796_v4  ;;  %v799_v56 = vadd.f32 %v1802_v3, %v798_v54  ;;  %v1966_v59 = vpop.f32.mrb[11].mxu1  ;;  %v802_v27 = vmul.f32 0.5, %v796_v4 }
 0x8af   :  { %v806_v62 = vmul.f32 %v804_v55, %v796_v4  ;;  %v805_v0 = vmul.f32 0.044715, %v799_v56  ;;  %v803_v61 = vmul.f32 0.5, %v799_v56 }
 0x8b1   :  { %v808_v6 = vmul.f32 %v806_v62, %v796_v4  ;;  %v807_v14 = vmul.f32 %v805_v0, %v799_v56 }
 0x8b3   :  { %v810_v16 = vadd.f32 %v808_v6, %v796_v4  ;;  %v809_v63 = vmul.f32 %v807_v14, %v799_v56 }
 0x8b5   :  { %v812_v18 = vmul.f32 0.7978846, %v810_v16  ;;  %v811_v2 = vadd.f32 %v809_v63, %v799_v56  ;;  %v2107_v63 = vld [vmem:[%s2829_s25] sm:$0xff]  }
 0x8b6   :  { %1980 = vmatpush3.bf16.msra.mxu1 %v2107_v63 }
 0x8b7   :  { %2151 = vtanh.f32 %v812_v18  ;;  %v813_v45 = vmul.f32 0.7978846, %v811_v2  ;;  %1981 = vmatprep.subr.bf16.mxu1 %v2259_v1  ;;  %v2108_v18 = vld [vmem:[%s2829_s25 + $0x8] sm:$0xff]  }
 0x8b9   :  { %2153 = vtanh.f32 %v813_v45 }
 0x8ba   :  { %1982 = vmatpush3.bf16.msra.mxu1 %v2108_v18 }
 0x8c1   :  { %v2152_v15 = vpop.eup %2151 }
 0x8c2   :  { %v816_v23 = vadd.f32 1.0, %v2152_v15 }
 0x8c3   :  { %v2154_v26 = vpop.eup %2153 }
 0x8c4   :  { %v817_v25 = vadd.f32 1.0, %v2154_v26  ;;  %v818_v30 = vmul.f32 %v816_v23, %v802_v27  ;;  %v1812_v26 = vld [vmem:[%s2830_s29] ss:$0 sm:$0xff] }
 0x8c6   :  { %v819_v44 = vmul.f32 %v817_v25, %v803_v61 }
 0x8c8   :  { %v820_v47 = vpack.c.bf16 %v819_v44, %v818_v30  ;;  %v1813_v30 = vld [vmem:[%s2831_s3] ss:$0 sm:$0xff] }
 0x8ca   :  { %1976 = vmatmul.mubr.msk.bf16.vlgmr.msra.gmra.mrb[20].mxu0 %vm686_vm4, %v820_v47 }
 0x8cb   :  { %1988 = vmatpush3.bf16.msra.mxu0 %v2441_v5  ;;  %1999 = vmatprep.mubr.msk.bf16.mxu0 %vm2260_vm0, %v2259_v1  ;;  %v1806_v5 = vld [vmem:[%s2828_s17] ss:$0 sm:$0xff] }
 0x8cc   :  { %1989 = vmatprep.subr.bf16.mxu0 %v2259_v1 }
 0x8cf   :  { %1990 = vmatpush3.bf16.msra.mxu0 %v2449_v7 }
 0x8d0   :  { %1991 = vmatprep.subr.bf16.mxu0 %v2259_v1 }
 0x8d3   :  { %1992 = vmatpush3.bf16.msra.mxu0 %v2453_v8 }
 0x8d4   :  { %1993 = vmatprep.subr.bf16.mxu0 %v2259_v1 }
 0x8d7   :  { %1994 = vmatpush3.bf16.msra.mxu0 %v2459_v9 }
 0x8d8   :  { %1995 = vmatprep.subr.bf16.mxu0 %v2259_v1 }
 0x8db   :  { %1996 = vmatpush3.bf16.msra.mxu0 %v2466_v10 }
 0x8dc   :  { %1997 = vmatprep.subr.bf16.mxu0 %v2259_v1 }
 0x8df   :  { %1998 = vmatpush3.bf16.msra.mxu0 %v2471_v11 }
 0x8e0   :  { %2023 = vmatprep.subr.bf16.mxu0 %v2259_v1 }
 0x99d   :  { %v897_v7 = vpop.f32.mrb[20].mxu0 }
 0x99e   :  { %v898_v48 = vadd.f32 %v1806_v5, %v897_v7  ;;  %v1977_v12 = vpop.f32.mrb[21].mxu0 }
 0x99f   :  { %v900_v32 = vpop.f32.mrb[22].mxu0  ;;  %v1814_v12 = vld [vmem:[%s2832_s8] ss:$0 sm:$0xff] }
 0x9a0   :  { %v906_v8 = vadd.f32 %v898_v48, %v2633_v51  ;;  %v901_v49 = vadd.f32 %v1806_v5, %v900_v32  ;;  %v1978_v29 = vpop.f32.mrb[23].mxu0 }
 0x9a2   :  { %v907_v9 = vadd.f32 %v901_v49, %v2635_v43  ;;  %v908_v39 = vmul.f32 %v906_v8, %v906_v8 }
 0x9a4   :  { %912 = vrot.lane.b32.xlu0 %v908_v39, %s2263_s9  ;;  %v909_v10 = vmul.f32 %v907_v9, %v907_v9 }
 0x9a6   :  { %914 = vrot.lane.b32.xlu1 %v909_v10, %s2263_s9 }
 0xa16   :  { %v913_v11 = vpop.permute.xlu0 %912 }
 0xa17   :  { %v918_v50 = vsel %vm186_vm1, %v906_v8, %v913_v11 }
 0xa18   :  { %v915_v53 = vpop.permute.xlu1 %914  ;;  %v920_v46 = vsel %vm686_vm4, %v918_v50, 0.0 }
 0xa19   :  { %v919_v3 = vsel %vm186_vm1, %v907_v9, %v915_v53 }
 0xa1a   :  { %v921_v51 = vsel %vm686_vm4, %v919_v3, 0.0 }
 0xa1b   :  { %v922_v4 = vadd.f32 %v921_v51, %v920_v46 }
 0xa1d   :  { %v923_v52 = vrot.slane %v922_v4, 4 }
 0xa1f   :  { %v924_v43 = vadd.f32 %v923_v52, %v922_v4 }
 0xa21   :  { %v925_v54 = vrot.slane %v924_v43, 2 }
 0xa23   :  { %v926_v55 = vadd.f32 %v925_v54, %v924_v43 }
 0xa25   :  { %v927_v56 = vrot.slane %v926_v55, 1 }
 0xa27   :  { %v928_v59 = vadd.f32 %v927_v56, %v926_v55 }
 0xa29   :  { %v929_v62 = vmul.f32 0.0625, %v928_v59 }
 0xa2b   :  { %v930_v0 = vmul.f32 %v929_v62, %v929_v62  ;;  %v936_v15 = vsub.f32 %v906_v8, %v929_v62  ;;  %v937_v23 = vsub.f32 %v907_v9, %v929_v62 }
 0xa2d   :  { %932 = vrot.lane.b32.xlu0 %v930_v0, %s2263_s9 }
 0xa9f   :  { %v933_v6 = vpop.permute.xlu0 %932 }
 0xaa0   :  { %v935_v14 = vsub.f32 %v929_v62, %v933_v6 }
 0xaa2   :  { %v938_v16 = vadd.f32 1e-05, %v935_v14 }
 0xaa4   :  { %2155 = vrsqrt.f32 %v938_v16 }
 0xaae   :  { %v2156_v2 = vpop.eup %2155 }
 0xaaf   :  { %v943_v45 = vrot.slane %v2156_v2, %v2626_v19 }
 0xab1   :  { %945 = vrot.lane.b32.xlu1 %v943_v45, %s2261_s0 }
 0xb23   :  { %v946_v27 = vpop.permute.xlu1 %945 }
 0xb24   :  { %v948_v61 = vmul.f32 %v946_v27, %v936_v15  ;;  %v949_v25 = vmul.f32 %v946_v27, %v937_v23 }
 0xb26   :  { %v956_v44 = vmul.f32 %v1812_v26, %v948_v61  ;;  %v957_v47 = vmul.f32 %v1812_v26, %v949_v25 }
 0xb28   :  { %v2683_v5 = vadd.f32 %v1813_v30, %v956_v44  ;;  %v2685_v7 = vadd.f32 %v1813_v30, %v957_v47 }
 0xb2a   :  { %v966_v48 = vpack.c.bf16 %v2685_v7, %v2683_v5 }
 0xb2c   :  { %1984 = vmatmul.mubr.msk.bf16.vlgmr.msra.gmra.mrb[12].mxu1 %vm186_vm1, %v966_v48 }
 0xbff   :  { %v1027_v32 = vpop.f32.mrb[12].mxu1 }
 0xc00   :  { %v1985_v8 = vpop.f32.mrb[13].mxu1  ;;  %v1028_v29 = vadd.f32 %v1814_v12, %v1027_v32 }
 0xc01   :  { %v1030_v49 = vpop.f32.mrb[14].mxu1 }
 0xc02   :  { %v1031_v9 = vadd.f32 %v1814_v12, %v1030_v49  ;;  %v1986_v39 = vpop.f32.mrb[15].mxu1  ;;  %v1034_v50 = vmul.f32 %v1028_v29, %v2480_v20 }
 0xc04   :  { %v1036_v10 = vpack.c.bf16 %v1031_v9, %v1028_v29  ;;  %v1035_v51 = vmul.f32 %v1031_v9, %v2486_v22 }
 0xc06   :  { %2000 = vmatmul.mubr.msk.bf16.vlgmr.msra.gmra.mrb[24].mxu0 %vm270_vm2, %v1036_v10 }
 0xc07   :  { %2027 = vmatprep.mubr.msk.bf16.mxu0 %vm2260_vm0, %v2259_v1 }
 0xcd9   :  { %v1074_v11 = vpop.f32.mrb[24].mxu0 }
 0xcda   :  { %v1081_v53 = vmul.f32 %v1074_v11, %v2483_v21  ;;  %v2001_v3 = vpop.f32.mrb[25].mxu0 }
 0xcdb   :  { %v1077_v46 = vpop.f32.mrb[26].mxu0 }
 0xcdc   :  { %v1083_v4 = vadd.f32 %v1081_v53, %v1034_v50  ;;  %v1082_v52 = vmul.f32 %v1077_v46, %v2489_v24  ;;  %v2002_v43 = vpop.f32.mrb[27].mxu0 }
 0xcde   :  { %v1084_v54 = vadd.f32 %v1082_v52, %v1035_v51  ;;  %v1086_v55 = vmul.f32 %v1083_v4, %v2496_v33  ;;  %v1088_v56 = vmul.f32 %v1083_v4, %v2499_v34  ;;  %v1090_v59 = vmul.f32 %v1083_v4, %v2502_v35 }
 0xcdf   :  { %v1092_v22 = vmul.f32 %v1083_v4, %v2514_v40 }
 0xce0   :  { %v2701_v62 = vpack.c.bf16 %v1084_v54, %v1083_v4  ;;  %v1087_v20 = vmul.f32 %v1084_v54, %v2505_v36  ;;  %v1089_v21 = vmul.f32 %v1084_v54, %v2508_v37  ;;  %v1091_v0 = vmul.f32 %v1084_v54, %v2511_v38 }
 0xce1   :  { %v1093_v24 = vmul.f32 %v1084_v54, %v2517_v41 }
 0xce2   :  { %1099 = vrot.lane.b32.xlu0 %v2701_v62, %s2261_s0  ;;  %v1094_v33 = vpack.c.bf16 %v1087_v20, %v1086_v55  ;;  %v1095_v6 = vpack.c.bf16 %v1089_v21, %v1088_v56  ;;  %v1096_v34 = vpack.c.bf16 %v1091_v0, %v1090_v59 }
 0xce3   :  { %v1097_v14 = vpack.c.bf16 %v1093_v24, %v1092_v22 }
 0xce4   :  { %2005 = vmatprep.mubr.msk.bf16.mxu1 %vm186_vm1, %v1094_v33 }
 0xd54   :  { %v1100_v35 = vpop.permute.xlu0 %1099 }
 0xd55   :  { %v1114_v36 = vsel %vm186_vm1, %v1100_v35, 0  ;;  %2052 = vmatprep.subr.msk.bf16.mxu1 %vm186_vm1, %v1100_v35 }
 0xd56   :  { %2004 = vmatpush3.bf16.xpose.msra.mxu1 %v1114_v36 }
 0xd5d   :  { %2006 = vmatmul.mubr.msk.bf16.vlgmr.msra.gmra.mrb[16].mxu1 %vm186_vm1, %v1095_v6 }
 0xd5e   :  { %2009 = vmatprep.mubr.msk.bf16.mxu1 %vm186_vm1, %v1096_v34 }
 0xd65   :  { %2010 = vmatmul.mubr.msk.bf16.gmra.mrb[20].mxu1 %vm186_vm1, %v1097_v14 }
 0xe30   :  { %v2007_v37 = vpop.f32.mrb[16].mxu1 }
 0xe31   :  { %v1150_v38 = vpop.f32.mrb[17].mxu1  ;;  %v1159_v45 = vadd.f32 %v2007_v37, %v2538_v57 }
 0xe32   :  { %v1151_v40 = vadd.f32 %v1150_v38, %v2541_v58  ;;  %v2008_v41 = vpop.f32.mrb[18].mxu1 }
 0xe33   :  { %v1153_v16 = vpop.f32.mrb[19].mxu1  ;;  %v1162_v63 = vadd.f32 %v2008_v41, %v2544_v60  ;;  %v1187_v60 = vsel %vm415_vm3, %v1159_v45, -inf }
 0xe34   :  { %v1154_v18 = vadd.f32 %v1153_v16, %v2551_v13  ;;  %v1181_v2 = vsel %vm415_vm3, %v1151_v40, -inf }
 0xe35   :  { %1182 = vmax.xlane.f32.xlu1 %v1181_v2  ;;  %v1190_v26 = vsel %vm415_vm3, %v1162_v63, -inf }
 0xe36   :  { %v1184_v15 = vsel %vm415_vm3, %v1154_v18, -inf }
 0xe37   :  { %1185 = vmax.xlane.f32.xlu0 %v1184_v15 }
 0xe38   :  { %v2011_v23 = vpop.f32.mrb[20].mxu1 }
 0xe39   :  { %v1166_v27 = vpop.f32.mrb[21].mxu1  ;;  %1191 = vmax.xlane.f32.xlu1 %v1190_v26  ;;  %v1175_v30 = vadd.f32 %v2011_v23, %v2557_v17 }
 0xe3a   :  { %v1167_v58 = vadd.f32 %v1166_v27, %v2562_v28  ;;  %v2012_v61 = vpop.f32.mrb[22].mxu1 }
 0xe3b   :  { %v1169_v25 = vpop.f32.mrb[23].mxu1  ;;  %1188 = vmax.xlane.f32.xlu0 %v1187_v60  ;;  %v1178_v57 = vadd.f32 %v2012_v61, %v2572_v42  ;;  %v1199_v48 = vsel %vm415_vm3, %v1175_v30, -inf }
 0xe3c   :  { %v1170_v13 = vadd.f32 %v1169_v25, %v2567_v31  ;;  %v1193_v44 = vsel %vm415_vm3, %v1167_v58, -inf }
 0xe3d   :  { %v1202_v28 = vsel %vm415_vm3, %v1178_v57, -inf }
 0xe3e   :  { %v1196_v47 = vsel %vm415_vm3, %v1170_v13, -inf }
 0xe3f   :  { %1194 = vmax.xlane.f32.xlu0 %v1193_v44  ;;  %1197 = vmax.xlane.f32.xlu1 %v1196_v47 }
 0xe43   :  { %1200 = vmax.xlane.f32.xlu0 %v1199_v48  ;;  %1203 = vmax.xlane.f32.xlu1 %v1202_v28 }
 0xec2   :  { %v1183_v12 = vpop.xlane.xlu1 %1182 }
 0xec3   :  { %v1205_v49 = vsub.f32 %v1151_v40, %v1183_v12 }
 0xec4   :  { %v1186_v32 = vpop.xlane.xlu0 %1185 }
 0xec5   :  { %v1206_v8 = vsub.f32 %v1154_v18, %v1186_v32  ;;  %v1213_v10 = vmul.f32 1.442695, %v1205_v49 }
 0xec6   :  { %v1192_v31 = vpop.xlane.xlu1 %1191 }
 0xec7   :  { %v1215_v17 = vmul.f32 1.442695, %v1206_v8  ;;  %v1208_v29 = vsub.f32 %v1162_v63, %v1192_v31 }
 0xec8   :  { %v1189_v42 = vpop.xlane.xlu0 %1188 }
 0xec9   :  { %2157 = vpow2.f32 %v1215_v17  ;;  %v1219_v9 = vmul.f32 1.442695, %v1208_v29  ;;  %v1207_v39 = vsub.f32 %v1159_v45, %v1189_v42 }
 0xecb   :  { %2159 = vpow2.f32 %v1219_v9  ;;  %v1217_v11 = vmul.f32 1.442695, %v1207_v39  ;;  %v2109_v39 = vld [vmem:[%s2833_s14] sm:$0xff]  }
 0xecc   :  { %v1195_v50 = vpop.xlane.xlu0 %1194  ;;  %v1198_v53 = vpop.xlane.xlu1 %1197  ;;  %2024 = vmatpush3.bf16.msra.mxu0 %v2109_v39 }
 0xecd   :  { %2161 = vpow2.f32 %v1217_v11  ;;  %v1210_v3 = vsub.f32 %v1170_v13, %v1198_v53  ;;  %v1209_v46 = vsub.f32 %v1167_v58, %v1195_v50  ;;  %2025 = vmatprep.subr.bf16.mxu0 %v2259_v1  ;;  %v2197_v50 = vld [vmem:[%s2295_s21 + $0x10] sm:$0xff] }
 0xece   :  { %2163 = vpow2.f32 %v1213_v10  ;;  %v2110_v10 = vld [vmem:[%s2833_s14 + $0x8] sm:$0xff]  }
 0xecf   :  { %v1223_v51 = vmul.f32 1.442695, %v1210_v3  ;;  %v1221_v56 = vmul.f32 1.442695, %v1209_v46  ;;  %v2198_v46 = vld [vmem:[%s2295_s21] sm:$0xff] }
 0xed0   :  { %v1201_v4 = vpop.xlane.xlu0 %1200  ;;  %v1204_v52 = vpop.xlane.xlu1 %1203  ;;  %2026 = vmatpush3.bf16.msra.mxu0 %v2110_v10 }
 0xed1   :  { %v1211_v43 = vsub.f32 %v1175_v30, %v1201_v4  ;;  %v1212_v54 = vsub.f32 %v1178_v57, %v1204_v52  ;;  %2165 = vpow2.f32 %v1223_v51  ;;  %2031 = vmatprep.subr.bf16.mxu0 %v2259_v1  ;;  %v2199_v52 = vld [vmem:[%s2295_s21 + $0x18] sm:$0xff] }
 0xed3   :  { %v2158_v55 = vpop.eup %2157  ;;  %v1225_v59 = vmul.f32 1.442695, %v1211_v43  ;;  %v1227_v20 = vmul.f32 1.442695, %v1212_v54 }
 0xed4   :  { %v1232_v21 = vsel %vm415_vm3, %v2158_v55, 0.0 }
 0xed5   :  { %v2160_v0 = vpop.eup %2159  ;;  %2167 = vpow2.f32 %v1225_v59  ;;  %1233 = vadd.xlane.f32.xlu1 %v1232_v21 }
 0xed6   :  { %2169 = vpow2.f32 %v1227_v20  ;;  %v1238_v33 = vsel %vm415_vm3, %v2160_v0, 0.0 }
 0xed7   :  { %v2162_v22 = vpop.eup %2161  ;;  %2171 = vpow2.f32 %v1221_v56  ;;  %v2200_v56 = vld [vmem:[%s2295_s21 + $0x8] sm:$0xff] }
 0xed8   :  { %v1235_v24 = vsel %vm415_vm3, %v2162_v22, 0.0  ;;  %v2164_v6 = vpop.eup %2163 }
 0xed9   :  { %1236 = vadd.xlane.f32.xlu0 %v1235_v24  ;;  %1239 = vadd.xlane.f32.xlu1 %v1238_v33  ;;  %v1229_v14 = vsel %vm415_vm3, %v2164_v6, 0.0 }
 0xedb   :  { %v2166_v34 = vpop.eup %2165 }
 0xedc   :  { %v1244_v35 = vsel %vm415_vm3, %v2166_v34, 0.0 }
 0xedd   :  { %1230 = vadd.xlane.f32.xlu0 %v1229_v14  ;;  %1245 = vadd.xlane.f32.xlu1 %v1244_v35 }
 0xedf   :  { %v2168_v36 = vpop.eup %2167 }
 0xee0   :  { %v2170_v37 = vpop.eup %2169  ;;  %v1247_v38 = vsel %vm415_vm3, %v2168_v36, 0.0 }
 0xee1   :  { %v2172_v40 = vpop.eup %2171  ;;  %1248 = vadd.xlane.f32.xlu0 %v1247_v38  ;;  %v1250_v41 = vsel %vm415_vm3, %v2170_v37, 0.0 }
 0xee2   :  { %1251 = vadd.xlane.f32.xlu1 %v1250_v41  ;;  %v1241_v16 = vsel %vm415_vm3, %v2172_v40, 0.0 }
 0xee5   :  { %1242 = vadd.xlane.f32.xlu0 %v1241_v16 }
 0xefb   :  { %1273 = vrot.lane.b32.xlu0 %v2701_v62, %s2262_s5 }
 0xf62   :  { %v1234_v63 = vpop.xlane.xlu1 %1233 }
 0xf66   :  { %v1237_v18 = vpop.xlane.xlu0 %1236  ;;  %v1240_v2 = vpop.xlane.xlu1 %1239 }
 0xf67   :  { %2173 = vrcp.f32 %v1237_v18 }
 0xf68   :  { %2175 = vrcp.f32 %v1240_v2  ;;  %v1827_v2 = vld [vmem:[%s2834_s19] ss:$0 sm:$0xff] }
 0xf69   :  { %2177 = vrcp.f32 %v1234_v63 }
 0xf6a   :  { %v1231_v45 = vpop.xlane.xlu0 %1230  ;;  %v1246_v15 = vpop.xlane.xlu1 %1245 }
 0xf6b   :  { %2179 = vrcp.f32 %v1231_v45 }
 0xf6e   :  { %v1249_v23 = vpop.xlane.xlu0 %1248 }
 0xf6f   :  { %2181 = vrcp.f32 %v1249_v23  ;;  %v1252_v26 = vpop.xlane.xlu1 %1251 }
 0xf70   :  { %2183 = vrcp.f32 %v1252_v26 }
 0xf71   :  { %v2174_v27 = vpop.eup %2173  ;;  %2185 = vrcp.f32 %v1246_v15 }
 0xf72   :  { %v2176_v58 = vpop.eup %2175  ;;  %v1243_v61 = vpop.xlane.xlu0 %1242  ;;  %v1263_v25 = vmul.f32 %v2174_v27, %v2162_v22  ;;  %v2201_v22 = vld [vmem:[%s2295_s21 + $0x20] sm:$0xff] }
 0xf73   :  { %v2178_v60 = vpop.eup %2177  ;;  %2187 = vrcp.f32 %v1243_v61  ;;  %v1264_v13 = vmul.f32 %v2176_v58, %v2160_v0 }
 0xf74   :  { %v1262_v44 = vmul.f32 %v2178_v60, %v2158_v55 }
 0xf75   :  { %v2180_v62 = vpop.eup %2179  ;;  %v1270_v28 = vpack.c.bf16 %v1264_v13, %v1263_v25 }
 0xf76   :  { %v1274_v30 = vpop.permute.xlu0 %1273  ;;  %v1261_v57 = vmul.f32 %v2180_v62, %v2164_v6 }
 0xf77   :  { %2013 = vmatprep.subr.bf16.mxu1 %v1274_v30 }
 0xf78   :  { %2014 = vmatpush3.bf16.msra.mxu1 %v1274_v30  ;;  %v1269_v47 = vpack.c.bf16 %v1262_v44, %v1261_v57 }
 0xf79   :  { %v2182_v48 = vpop.eup %2181  ;;  %2039 = vmatprep.subr.bf16.mxu1 %v2259_v1 }
 0xf7a   :  { %v2184_v12 = vpop.eup %2183  ;;  %2015 = vmatprep.mubr.msk.bf16.mxu1 %vm415_vm3, %v1269_v47  ;;  %v1267_v31 = vmul.f32 %v2182_v48, %v2168_v36  ;;  %v2203_v36 = vld [vmem:[%s2295_s21 + $0x28] sm:$0xff] }
 0xf7b   :  { %v2186_v32 = vpop.eup %2185  ;;  %2016 = vmatmul.mubr.msk.bf16.vlgmr.msra.gmra.mrb[24].mxu1 %vm415_vm3, %v1270_v28  ;;  %v1268_v49 = vmul.f32 %v2184_v12, %v2170_v37 }
 0xf7c   :  { %v1266_v29 = vmul.f32 %v2186_v32, %v2166_v34  ;;  %v2202_v34 = vld [vmem:[%s2295_s21 + $0x30] sm:$0xff] }
 0xf7d   :  { %v2188_v8 = vpop.eup %2187  ;;  %v1272_v9 = vpack.c.bf16 %v1268_v49, %v1267_v31 }
 0xf7e   :  { %v1265_v17 = vmul.f32 %v2188_v8, %v2172_v40  ;;  %v2204_v40 = vld [vmem:[%s2295_s21 + $0x38] sm:$0xff]  ;;  %s2835_s21 = sld [smem:[#allocation15_spill]] }
 0xf80   :  { %v1271_v42 = vpack.c.bf16 %v1266_v29, %v1265_v17 }
 0xf82   :  { %2019 = vmatprep.mubr.msk.bf16.mxu1 %vm415_vm3, %v1271_v42 }
 0xf83   :  { %2020 = vmatmul.mubr.msk.bf16.gmra.mrb[28].mxu1 %vm415_vm3, %v1272_v9 }
 0xf84   :  { %2047 = vmatprep.mubr.msk.bf16.mxu1 %vm2260_vm0, %v2259_v1  ;;  %v2111_v39 = vld [vmem:[%s2835_s21] sm:$0xff]   ;;  %v2112_v10 = vld [vmem:[%s2835_s21 + $0x8] sm:$0xff]  }
0x104e   :  { %v2017_v11 = vpop.f32.mrb[24].mxu1 }
0x104f   :  { %v1355_v53 = vmul.f32 %v2197_v50, %v2017_v11  ;;  %v1322_v3 = vpop.f32.mrb[25].mxu1 }
0x1050   :  { %v1353_v51 = vmul.f32 %v2198_v46, %v1322_v3  ;;  %v2018_v4 = vpop.f32.mrb[26].mxu1  ;;  %v1831_v46 = vld [vmem:[%s2836_s24] ss:$0 sm:$0xff] }
0x1051   :  { %v1356_v43 = vmul.f32 %v2199_v52, %v2018_v4  ;;  %v1325_v54 = vpop.f32.mrb[27].mxu1 }
0x1052   :  { %v1357_v55 = vadd.f32 %v1355_v53, %v1353_v51  ;;  %v1354_v59 = vmul.f32 %v2200_v56, %v1325_v54 }
0x1054   :  { %v1358_v20 = vadd.f32 %v1356_v43, %v1354_v59  ;;  %v1832_v43 = vld [vmem:[%s2837_s30] ss:$0 sm:$0xff] }
0x1056   :  { %v2021_v21 = vpop.f32.mrb[28].mxu1 }
0x1057   :  { %v1338_v0 = vpop.f32.mrb[29].mxu1  ;;  %v1363_v14 = vmul.f32 %v2202_v34, %v2021_v21  ;;  %v2113_v21 = vld [vmem:[%s2838_s12] sm:$0xff]  }
0x1058   :  { %v1359_v24 = vmul.f32 %v2201_v22, %v1338_v0  ;;  %v2022_v33 = vpop.f32.mrb[30].mxu1  ;;  %2040 = vmatpush3.bf16.msra.mxu1 %v2113_v21  ;;  %v2114_v0 = vld [vmem:[%s2838_s12 + $0x8] sm:$0xff]   ;;  %v2115_v22 = vld [vmem:[%s2838_s12 + $0x10] sm:$0xff]   ;;  %v1843_v21 = vld [vmem:[%s2415_s27] ss:$0 sm:$0xff] }
0x1059   :  { %v1341_v6 = vpop.f32.mrb[31].mxu1  ;;  %v1364_v41 = vmul.f32 %v2204_v40, %v2022_v33  ;;  %2041 = vmatprep.subr.bf16.mxu1 %v2259_v1  ;;  %v1833_v33 = vld [vmem:[%s2839_s15] ss:$0 sm:$0xff] }
0x105a   :  { %v1361_v35 = vadd.f32 %v1359_v24, %v1357_v55  ;;  %v1360_v37 = vmul.f32 %v2203_v36, %v1341_v6  ;;  %v2116_v24 = vld [vmem:[%s2838_s12 + $0x18] sm:$0xff]  }
0x105c   :  { %v1365_v38 = vadd.f32 %v1363_v14, %v1361_v35  ;;  %v1362_v16 = vadd.f32 %v1360_v37, %v1358_v20  ;;  %2042 = vmatpush3.bf16.msra.mxu1 %v2114_v0 }
0x105d   :  { %2043 = vmatprep.subr.bf16.mxu1 %v2259_v1 }
0x105e   :  { %v1366_v63 = vadd.f32 %v1364_v41, %v1362_v16 }
0x1060   :  { %v1367_v18 = vpack.c.bf16 %v1366_v63, %v1365_v38  ;;  %2044 = vmatpush3.bf16.msra.mxu1 %v2115_v22 }
0x1061   :  { %2045 = vmatprep.subr.bf16.mxu1 %v2259_v1 }
0x1062   :  { %2028 = vmatmul.mubr.msk.bf16.vlgmr.msra.gmra.mrb[28].mxu0 %vm186_vm1, %v1367_v18 }
0x1063   :  { %2035 = vmatprep.mubr.msk.bf16.mxu0 %vm2260_vm0, %v2259_v1  ;;  %2032 = vmatpush3.bf16.msra.mxu0 %v2111_v39 }
0x1064   :  { %2033 = vmatprep.subr.bf16.mxu0 %v2259_v1  ;;  %2046 = vmatpush3.bf16.msra.mxu1 %v2116_v24 }
0x1067   :  { %2034 = vmatpush3.bf16.msra.mxu0 %v2112_v10 }
0x1135   :  { %v1428_v45 = vpop.f32.mrb[28].mxu0 }
0x1136   :  { %v1429_v15 = vadd.f32 %v1827_v2, %v1428_v45  ;;  %v2029_v23 = vpop.f32.mrb[29].mxu0 }
0x1137   :  { %v1431_v26 = vpop.f32.mrb[30].mxu0 }
0x1138   :  { %v1437_v27 = vadd.f32 %v1429_v15, %v2683_v5  ;;  %v1432_v58 = vadd.f32 %v1827_v2, %v1431_v26  ;;  %v2030_v61 = vpop.f32.mrb[31].mxu0 }
0x113a   :  { %v1438_v60 = vadd.f32 %v1432_v58, %v2685_v7  ;;  %v1439_v62 = vmul.f32 %v1437_v27, %v1437_v27 }
0x113c   :  { %1443 = vrot.lane.b32.xlu1 %v1439_v62, %s2263_s9  ;;  %v1440_v25 = vmul.f32 %v1438_v60, %v1438_v60 }
0x1140   :  { %1445 = vrot.lane.b32.xlu1 %v1440_v25, %s2263_s9 }
0x11ae   :  { %v1444_v13 = vpop.permute.xlu1 %1443 }
0x11af   :  { %v1449_v30 = vsel %vm186_vm1, %v1437_v27, %v1444_v13 }
0x11b0   :  { %v1451_v47 = vsel %vm686_vm4, %v1449_v30, 0.0  ;;  %v1837_v30 = vld [vmem:[%s2410_s20] ss:$0 sm:$0xff]  ;;  %s2264_s20 = smov [#allocation2]  }
0x11b1   :  { %s1736_s16 = sshll.u32 %s2264_s20, 4  ;;  %s1737_s16 = int_to_ptr.vmem [resolvable:$true] %s1736_s16 }
0x11b2   :  { %v1446_v57 = vpop.permute.xlu1 %1445  ;;  %s2205_s18 = scalar_lea.vmem %s1737_s16, 256  ;;  %p2210_p1 = scmp.lt.s32.totalorder %s1737_s16, %s1737_s16 }
0x11b3   :  { %v1450_v44 = vsel %vm186_vm1, %v1438_v60, %v1446_v57  ;;  %p2206_p0 = scmp.ne.s32.totalorder %s1737_s16, %s2205_s18  ;;  %p2211_p2 = scmp.lt.s32.totalorder %s2205_s18, %s2205_s18 }
0x11b4   :  { %v1452_v5 = vsel %vm686_vm4, %v1450_v44, 0.0 }
0x11b5   :  { %v1453_v48 = vadd.f32 %v1452_v5, %v1451_v47  ;;  %p2212_p3 = por %p2211_p2, %p2210_p1 }
0x11b7   :  { %v1454_v28 = vrot.slane %v1453_v48, 4  ;;  %p2213_p4 = pnand %p2212_p3, %p2206_p0 }
0x11b9   :  { %v1455_v7 = vadd.f32 %v1454_v28, %v1453_v48 }
0x11bb   :  { %v1456_v12 = vrot.slane %v1455_v7, 2 }
0x11bd   :  { %v1457_v32 = vadd.f32 %v1456_v12, %v1455_v7 }
0x11bf   :  { %v1458_v8 = vrot.slane %v1457_v32, 1 }
0x11c1   :  { %v1459_v31 = vadd.f32 %v1458_v8, %v1457_v32 }
0x11c3   :  { %v1460_v49 = vmul.f32 0.0625, %v1459_v31 }
0x11c5   :  { %v1461_v17 = vmul.f32 %v1460_v49, %v1460_v49  ;;  %v1467_v53 = vsub.f32 %v1437_v27, %v1460_v49  ;;  %v1468_v3 = vsub.f32 %v1438_v60, %v1460_v49 }
0x11c7   :  { %1463 = vrot.lane.b32.xlu0 %v1461_v17, %s2263_s9 }
0x1239   :  { %v1464_v29 = vpop.permute.xlu0 %1463 }
0x123a   :  { %v1466_v42 = vsub.f32 %v1460_v49, %v1464_v29 }
0x123c   :  { %v1469_v9 = vadd.f32 1e-05, %v1466_v42 }
0x123e   :  { %2189 = vrsqrt.f32 %v1469_v9 }
0x1248   :  { %v2190_v11 = vpop.eup %2189 }
0x1249   :  { %v1474_v50 = vrot.slane %v2190_v11, %v2626_v19 }
0x124b   :  { %1476 = vrot.lane.b32.xlu1 %v1474_v50, %s2261_s0 }
0x12bd   :  { %v1477_v51 = vpop.permute.xlu1 %1476 }
0x12be   :  { %v1479_v4 = vmul.f32 %v1477_v51, %v1467_v53  ;;  %v1480_v52 = vmul.f32 %v1477_v51, %v1468_v3 }
0x12c0   :  { %v1487_v54 = vmul.f32 %v1831_v46, %v1479_v4  ;;  %v1488_v55 = vmul.f32 %v1831_v46, %v1480_v52 }
0x12c2   :  { %v1495_v56 = vadd.f32 %v1832_v43, %v1487_v54  ;;  %v1496_v59 = vadd.f32 %v1832_v43, %v1488_v55 }
0x12c4   :  { %v1497_v20 = vpack.c.bf16 %v1496_v59, %v1495_v56 }
0x12c6   :  { %2036 = vmatmul.mubr.msk.bf16.vlgmr.msra.gmra.mrb[32].mxu0 %vm186_vm1, %v1497_v20 }
0x1399   :  { %v1558_v6 = vpop.f32.mrb[32].mxu0 }
0x139a   :  { %v1559_v34 = vadd.f32 %v1833_v33, %v1558_v6  ;;  %v2037_v14 = vpop.f32.mrb[33].mxu0 }
0x139b   :  { %v1561_v35 = vpop.f32.mrb[34].mxu0 }
0x139c   :  { %v1567_v36 = vmul.f32 0.044715, %v1559_v34  ;;  %v1562_v37 = vadd.f32 %v1833_v33, %v1561_v35  ;;  %v2038_v38 = vpop.f32.mrb[35].mxu0  ;;  %v1565_v58 = vmul.f32 0.5, %v1559_v34  ;;  %v1844_v33 = vld [vmem:[%s2420_s4] ss:$0 sm:$0xff] }
0x139e   :  { %v1569_v40 = vmul.f32 %v1567_v36, %v1559_v34  ;;  %v1568_v41 = vmul.f32 0.044715, %v1562_v37  ;;  %v1566_v61 = vmul.f32 0.5, %v1562_v37 }
0x13a0   :  { %v1571_v16 = vmul.f32 %v1569_v40, %v1559_v34  ;;  %v1570_v63 = vmul.f32 %v1568_v41, %v1562_v37 }
0x13a2   :  { %v1573_v18 = vadd.f32 %v1571_v16, %v1559_v34  ;;  %v1572_v2 = vmul.f32 %v1570_v63, %v1562_v37 }
0x13a4   :  { %v1575_v45 = vmul.f32 0.7978846, %v1573_v18  ;;  %v1574_v15 = vadd.f32 %v1572_v2, %v1562_v37 }
0x13a6   :  { %2191 = vtanh.f32 %v1575_v45  ;;  %v1576_v1 = vmul.f32 0.7978846, %v1574_v15 }
0x13a8   :  { %2193 = vtanh.f32 %v1576_v1 }
0x13b0   :  { %v2192_v23 = vpop.eup %2191 }
0x13b1   :  { %v1579_v26 = vadd.f32 1.0, %v2192_v23 }
0x13b2   :  { %v2194_v27 = vpop.eup %2193 }
0x13b3   :  { %v1580_v60 = vadd.f32 1.0, %v2194_v27  ;;  %v1581_v62 = vmul.f32 %v1579_v26, %v1565_v58 }
0x13b5   :  { %v1582_v25 = vmul.f32 %v1580_v60, %v1566_v61 }
0x13b7   :  { %v1583_v13 = vpack.c.bf16 %v1582_v25, %v1581_v62 }
0x13b9   :  { %2048 = vmatmul.mubr.msk.bf16.vlgmr.msra.gmra.mrb[32].mxu1 %vm686_vm4, %v1583_v13 }
0x148c   :  { %v1660_v57 = vpop.f32.mrb[32].mxu1 }
0x148d   :  { %v1661_v44 = vadd.f32 %v1837_v30, %v1660_v57  ;;  %v2049_v47 = vpop.f32.mrb[33].mxu1 }
0x148e   :  { %v1663_v5 = vpop.f32.mrb[34].mxu1 }
0x148f   :  { %v1669_v48 = vadd.f32 %v1661_v44, %v1495_v56  ;;  %v1664_v28 = vadd.f32 %v1837_v30, %v1663_v5  ;;  %v2050_v7 = vpop.f32.mrb[35].mxu1 }
0x1491   :  { %v1670_v12 = vadd.f32 %v1664_v28, %v1496_v59  ;;  %v1671_v32 = vmul.f32 %v1669_v48, %v1669_v48 }
0x1493   :  { %1675 = vrot.lane.b32.xlu0 %v1671_v32, %s2263_s9  ;;  %v1672_v8 = vmul.f32 %v1670_v12, %v1670_v12 }
0x1495   :  { %1677 = vrot.lane.b32.xlu1 %v1672_v8, %s2263_s9 }
0x1505   :  { %v1676_v31 = vpop.permute.xlu0 %1675 }
0x1506   :  { %v1681_v49 = vsel %vm186_vm1, %v1669_v48, %v1676_v31 }
0x1507   :  { %v1678_v17 = vpop.permute.xlu1 %1677  ;;  %v1683_v42 = vsel %vm686_vm4, %v1681_v49, 0.0 }
0x1508   :  { %v1682_v29 = vsel %vm186_vm1, %v1670_v12, %v1678_v17 }
0x1509   :  { %v1684_v9 = vsel %vm686_vm4, %v1682_v29, 0.0 }
0x150a   :  { %v1685_v39 = vadd.f32 %v1684_v9, %v1683_v42 }
0x150c   :  { %v1686_v10 = vrot.slane %v1685_v39, 4 }
0x150e   :  { %v1687_v11 = vadd.f32 %v1686_v10, %v1685_v39 }
0x1510   :  { %v1688_v50 = vrot.slane %v1687_v11, 2 }
0x1512   :  { %v1689_v53 = vadd.f32 %v1688_v50, %v1687_v11 }
0x1514   :  { %v1690_v3 = vrot.slane %v1689_v53, 1 }
0x1516   :  { %v1691_v46 = vadd.f32 %v1690_v3, %v1689_v53 }
0x1518   :  { %v1692_v51 = vmul.f32 0.0625, %v1691_v46 }
0x151a   :  { %v1693_v4 = vmul.f32 %v1692_v51, %v1692_v51  ;;  %v1699_v59 = vsub.f32 %v1669_v48, %v1692_v51  ;;  %v1700_v20 = vsub.f32 %v1670_v12, %v1692_v51 }
0x151c   :  { %1695 = vrot.lane.b32.xlu0 %v1693_v4, %s2263_s9 }
0x158e   :  { %v1696_v52 = vpop.permute.xlu0 %1695 }
0x158f   :  { %v1698_v43 = vsub.f32 %v1692_v51, %v1696_v52 }
0x1591   :  { %v1701_v54 = vadd.f32 1e-05, %v1698_v43 }
0x1593   :  { %2195 = vrsqrt.f32 %v1701_v54 }
0x159d   :  { %v2196_v55 = vpop.eup %2195 }
0x159e   :  { %v1706_v56 = vrot.slane %v2196_v55, %v2626_v19 }
0x15a0   :  { %1708 = vrot.lane.b32.xlu1 %v1706_v56, %s2261_s0 }
0x1612   :  { %v1709_v0 = vpop.permute.xlu1 %1708 }
0x1613   :  { %v1711_v22 = vmul.f32 %v1709_v0, %v1699_v59  ;;  %v1712_v24 = vmul.f32 %v1709_v0, %v1700_v20 }
0x1615   :  { %v1719_v6 = vmul.f32 %v1843_v21, %v1711_v22  ;;  %v1720_v34 = vmul.f32 %v1843_v21, %v1712_v24 }
0x1617   :  { %v1727_v14 = vadd.f32 %v1844_v33, %v1719_v6  ;;  %v1728_v35 = vadd.f32 %v1844_v33, %v1720_v34 }
0x1619   :  { %1729 = vst.msk [vmem:[#allocation2] sm:$0xff] %vm186_vm1, %v1727_v14  ;;  %1730 = vst.msk [vmem:[#allocation2 + $0x8] sm:$0xff] %vm186_vm1, %v1728_v35 }
0x161a   :  { %2216 = shalt.err (!%p2213_p4)
}
0x161b   :  { %s2217_s27 = scalar_lea.hbm %s2425_s6, 256 }
0x161c   :  { %p2218_p5 = scmp.ne.s32.totalorder %s2425_s6, %s2217_s27  ;;  %p2221_p6 = scmp.lt.u32.totalorder %s2217_s27, %s2425_s6 }
0x161e   :  { %p2223_p7 = pnand %p2221_p6, %p2218_p5 }
0x1620   :  { %2226 = shalt.err (!%p2223_p7)
}
0x1621   :  { %s2265_s4 = smov 128   ;;  %s2266_s22 = smov 8  }
0x1622   :  { %1742 = dma.vmem_to_hbm [thread:$0]  %s1737_s16, 256, %s2425_s6, [#allocation3], %s2265_s4, %s2265_s4, %s2266_s22  }
0x1623   :  { %2227 = dma.done.wait [#allocation3], 256  }
0x1624   :  { %2228 = vsyncadd [#allocation3], 4294967040 }
0x1625   :  { %1746 = vsyncpa [#allocation3], 1 }

</bundles_post_ra>
